<compile_context>
chip_gen: v7x
topology: tpu7x:2x2x1
jax: 0.10.0
libtpu: 0.0.40
codegen_flags: <defaults>
</compile_context>

<pallas_src>
import jax
import jax.numpy as jnp
from jax.experimental import pallas as pl
from jax.experimental.pallas import tpu as pltpu

LANE = 128


def _round_up(n: int, m: int) -> int:
    return ((n + m - 1) // m) * m


# ---------------------------------------------------------------------------
# Shared in-kernel forward (one tile of the batch).  All layer widths arrive
# pre-padded to multiples of 128; padded lanes are exact zeros all the way
# through (zero weight cols/rows + zero bias + ReLU(0)=0), so they never
# contaminate real lanes or the global adv sum.
# ---------------------------------------------------------------------------
def _make_forward(n_shared, fuse, n_vmid, n_amid, cd):
    def forward(prm, x):
        pos = [0]

        def nxt():
            w, b = prm[pos[0]], prm[pos[0] + 1]
            pos[0] += 2
            return w, b

        def lin_relu(h, w_ref, b_ref, out_dtype=cd):
            # MXU matmul, f32 accumulation, ReLU in f32, store activation in bf16.
            y = jnp.dot(h, w_ref[...], preferred_element_type=jnp.float32) + b_ref[...]
            y = jnp.maximum(y, 0.0)
            return y if out_dtype is None else y.astype(out_dtype)

        # shared trunk (input layer + hidden shared layers), all ReLU
        h = x
        for _ in range(n_shared):
            w, b = nxt()
            h = lin_relu(h, w, b)

        # fused first value/adv layer: one wide MXU push on the shared activation;
        # downstream weights are zero-row padded so no lane slicing is needed.
        if fuse:
            w, b = nxt()
            h = lin_relu(h, w, b)
        v_act = a_act = h

        # value stream: hidden matmuls, then (K -> 1) as a VPU multiply + XLU
        # row-reduce instead of a 1-column matmul.
        for _ in range(n_vmid):
            w, b = nxt()
            v_act = lin_relu(v_act, w, b)
        wv, bv = nxt()                      # wv: (1, K) f32 row, bv: (1, 1) f32
        v = jnp.maximum(
            jnp.sum(v_act.astype(jnp.float32) * wv[...], axis=-1, keepdims=True)
            + bv[...], 0.0)

        # advantage stream: hidden matmuls, final matmul padded to 128 lanes.
        for _ in range(n_amid):
            w, b = nxt()
            a_act = lin_relu(a_act, w, b)
        wa, ba = nxt()
        adv = lin_relu(a_act, wa, ba, out_dtype=None)   # f32; padded cols exactly 0

        return v + adv, adv

    return forward


# ---------------------------------------------------------------------------
# Kernel bodies
# ---------------------------------------------------------------------------
def _make_single_pass_kernel(layout, tile_b, true_b, num_actions, cd):
    """Whole batch fits in one tile: forward + global mean + subtract in ONE step."""
    forward = _make_forward(*layout, cd)
    inv_count = 1.0 / float(true_b * num_actions)
    mask_rows = tile_b > true_b

    def kernel(*refs):
        x_ref, prm, out_ref = refs[0], refs[1:-1], refs[-1]
        vpa, adv = forward(prm, x_ref[...])
        if mask_rows:                       # zero padded batch rows out of the mean
            rows = jax.lax.broadcasted_iota(jnp.int32, adv.shape, 0)
            adv = jnp.where(rows < true_b, adv, 0.0)
        mean = jnp.sum(adv, keepdims=True) * inv_count   # exact PyTorch adv.mean()
        out_ref[...] = vpa - mean

    return kernel


def _make_tiled_forward_kernel(layout, tile_b, true_b, cd):
    """Multi-tile forward: per-tile (v+adv) plus per-tile masked adv partial sum.
    Fully independent per tile -> megacore-parallel on v7x."""
    forward = _make_forward(*layout, cd)

    def kernel(*refs):
        x_ref, prm, vpa_ref, psum_ref = refs[0], refs[1:-2], refs[-2], refs[-1]
        i = pl.program_id(0)
        vpa, adv = forward(prm, x_ref[...])
        rows = jax.lax.broadcasted_iota(jnp.int32, adv.shape, 0) + i * tile_b
        s = jnp.sum(jnp.where(rows < true_b, adv, 0.0), keepdims=True)   # (1, 1)
        vpa_ref[...] = vpa
        ii = jax.lax.broadcasted_iota(jnp.int32, (8, LANE), 0)
        jj = jax.lax.broadcasted_iota(jnp.int32, (8, LANE), 1)
        psum_ref[...] = jnp.where((ii == 0) & (jj == 0), s, 0.0)

    return kernel


def _make_epilogue_kernel(inv_count):
    """Q = (v + adv) - global_mean.  Pure VPU subtract + lane-dense store."""
    def kernel(vpa_ref, psum_ref, out_ref):
        mean = jnp.sum(psum_ref[...], keepdims=True) * inv_count
        out_ref[...] = vpa_ref[...] - mean
    return kernel


# ---------------------------------------------------------------------------
# Wrapper: parameter padding/layout + pallas_call plumbing
# ---------------------------------------------------------------------------
def dueling_dqn_forward(x, shared_params, value_params, adv_params, *,
                        tile_b=None, compute_dtype=jnp.bfloat16):
    """x: (B, size_in). *_params: lists of (W(in,out), b(out,)), torch layer order."""
    f32 = jnp.float32
    cd = jnp.dtype(compute_dtype)

    B, size_in = int(x.shape[0]), int(x.shape[1])
    num_actions = int(adv_params[-1][0].shape[1])
    a_pad = _round_up(num_actions, LANE)

    nv_hidden = len(value_params) - 1
    na_hidden = len(adv_params) - 1
    fuse = (nv_hidden > 0) and (na_hidden > 0)

    # padded (lane-dense) hidden widths
    S = int(shared_params[0][0].shape[1]); Sp = _round_up(S, LANE)
    V = int(value_params[0][0].shape[1]) if nv_hidden > 0 else 0
    A = int(adv_params[0][0].shape[1]) if na_hidden > 0 else 0
    Vp = _round_up(V, LANE) if nv_hidden > 0 else 0
    Ap = _round_up(A, LANE) if na_hidden > 0 else 0

    def place_w(w, in_frame, out_frame, in_off=0):
        w = jnp.asarray(w, f32)
        return jnp.pad(w, ((in_off, in_frame - in_off - int(w.shape[0])),
                           (0, out_frame - int(w.shape[1]))))

    def place_b(b, out_frame):
        b = jnp.asarray(b, f32).reshape(1, -1)
        return jnp.pad(b, ((0, 0), (0, out_frame - int(b.shape[1]))))

    flat = []

    def emit(w, b, w_dtype=cd):
        flat.append(w.astype(w_dtype))      # weights bf16 (MXU), biases stay f32
        flat.append(b)

    # ---- shared trunk ----
    w0, b0 = shared_params[0]
    emit(place_w(w0, size_in, Sp), place_b(b0, Sp))
    for (w, b) in shared_params[1:]:
        emit(place_w(w, Sp, Sp), place_b(b, Sp))
    n_shared = len(shared_params)

    # ---- first value/adv layers, fused into one wide matmul when both exist ----
    if fuse:
        (wv0, bv0), (wa0, ba0) = value_params[0], adv_params[0]
        emit(jnp.concatenate([place_w(wv0, Sp, Vp), place_w(wa0, Sp, Ap)], axis=1),
             jnp.concatenate([place_b(bv0, Vp), place_b(ba0, Ap)], axis=1))
        v_rest, a_rest = list(value_params[1:]), list(adv_params[1:])
        v_frame, v_off = Vp + Ap, 0          # value half of fused act at lanes [0, Vp)
        a_frame, a_off = Vp + Ap, Vp         # adv half at lanes [Vp, Vp+Ap)
    else:
        v_rest, a_rest = list(value_params), list(adv_params)
        v_frame, v_off = Sp, 0
        a_frame, a_off = Sp, 0

    # ---- value stream: hidden matmuls, then the (K -> 1) head as an f32 row ----
    v_mid = v_rest[:-1]
    n_vmid = len(v_mid)
    for (w, b) in v_mid:
        emit(place_w(w, v_frame, Vp, v_off), place_b(b, Vp))
        v_frame, v_off = Vp, 0
    wv_last, bv_last = v_rest[-1]
    wv_row = place_w(wv_last, v_frame, 1, v_off).reshape(1, v_frame)
    emit(wv_row, jnp.asarray(bv_last, f32).reshape(1, 1), w_dtype=f32)

    # ---- advantage stream: hidden matmuls, final layer padded to a_pad lanes ----
    a_mid = a_rest[:-1]
    n_amid = len(a_mid)
    for (w, b) in a_mid:
        emit(place_w(w, a_frame, Ap, a_off), place_b(b, Ap))
        a_frame, a_off = Ap, 0
    wa_last, ba_last = a_rest[-1]
    emit(place_w(wa_last, a_frame, a_pad, a_off), place_b(ba_last, a_pad))

    layout = (n_shared, fuse, n_vmid, n_amid)

    # ---- batch tiling: biggest tile that keeps activation temps modest.
    # Small batches collapse to a single tile -> one grid step total.
    max_width = max(Sp, (Vp + Ap) if fuse else 0, Vp, Ap, a_pad)
    if tile_b is None:
        tile_b = 256 if max_width >= 512 else 512
    tile_b = _round_up(int(min(tile_b, _round_up(B, 16))), 16)
    b_pad = _round_up(B, tile_b)
    nt = b_pad // tile_b

    # batch-padded input in the compute dtype (halves x HBM traffic for bf16)
    x_p = jnp.asarray(x, f32)
    if b_pad > B:
        x_p = jnp.pad(x_p, ((0, b_pad - B), (0, 0)))
    x_p = x_p.astype(cd)

    def const_spec(a):
        return pl.BlockSpec(a.shape, lambda i: (0, 0))   # VMEM-resident, one DMA

    # VMEM budget: double-buffered params + x/out tiles + f32 activation temps.
    param_bytes = sum(int(a.size) * a.dtype.itemsize for a in flat)
    act_bytes = 6 * tile_b * max(max_width, size_in) * 4
    io_bytes = 2 * (tile_b * size_in * cd.itemsize + tile_b * a_pad * 4 + 8 * LANE * 4)
    vmem_limit = int(min(max(2 * param_bytes + act_bytes + io_bytes + (4 << 20),
                             32 << 20), 48 << 20))

    weight_elems = sum(int(a.size) for a in flat[0::2])
    flops = int(2 * weight_elems * b_pad)                # single forward sweep
    bytes_accessed = int(param_bytes + x_p.size * cd.itemsize + b_pad * a_pad * 4)
    cost = pl.CostEstimate(flops=flops, transcendentals=0,
                           bytes_accessed=bytes_accessed)

    x_spec = pl.BlockSpec((tile_b, size_in), lambda i: (i, 0))
    out_spec = pl.BlockSpec((tile_b, a_pad), lambda i: (i, 0))
    inv_count = 1.0 / float(B * num_actions)

    if nt == 1:
        # ---- single grid step: forward + global mean + subtract + store ----
        kernel = _make_single_pass_kernel(layout, tile_b, B, num_actions, cd)
        out = pl.pallas_call(
            kernel,
            out_shape=jax.ShapeDtypeStruct((b_pad, a_pad), f32),
            grid_spec=pltpu.PrefetchScalarGridSpec(
                num_scalar_prefetch=0,
                grid=(1,),
                in_specs=[x_spec] + [const_spec(a) for a in flat],
                out_specs=out_spec),
            compiler_params=pltpu.CompilerParams(
                dimension_semantics=("arbitrary",),
                vmem_limit_bytes=vmem_limit),
            cost_estimate=cost,
        )(x_p, *flat)
        return out[:B, :num_actions]

    # ---- multi-tile: parallel forward kernel (v+adv plus per-tile adv partial
    # sums), then a trivial parallel epilogue kernel for the global-mean subtract.
    # Both stages are independent per batch tile -> megacore-shardable on v7x.
    fwd_kernel = _make_tiled_forward_kernel(layout, tile_b, B, cd)
    vpa, partials = pl.pallas_call(
        fwd_kernel,
        out_shape=(jax.ShapeDtypeStruct((b_pad, a_pad), f32),
                   jax.ShapeDtypeStruct((8 * nt, LANE), f32)),
        grid_spec=pltpu.PrefetchScalarGridSpec(
            num_scalar_prefetch=0,
            grid=(nt,),
            in_specs=[x_spec] + [const_spec(a) for a in flat],
            out_specs=(out_spec, pl.BlockSpec((8, LANE), lambda i: (i, 0)))),
        compiler_params=pltpu.CompilerParams(
            dimension_semantics=("parallel",),
            vmem_limit_bytes=vmem_limit),
        cost_estimate=cost,
    )(x_p, *flat)

    epi_kernel = _make_epilogue_kernel(inv_count)
    out = pl.pallas_call(
        epi_kernel,
        out_shape=jax.ShapeDtypeStruct((b_pad, a_pad), f32),
        grid_spec=pltpu.PrefetchScalarGridSpec(
            num_scalar_prefetch=0,
            grid=(nt,),
            in_specs=[pl.BlockSpec((tile_b, a_pad), lambda i: (i, 0)),
                      pl.BlockSpec((8 * nt, LANE), lambda i: (0, 0))],
            out_specs=out_spec),
        compiler_params=pltpu.CompilerParams(
            dimension_semantics=("parallel",),
            vmem_limit_bytes=32 << 20),
    )(vpa, partials)
    return out[:B, :num_actions]


# ---------------------------------------------------------------------------
# Deterministic parameter construction (mirrors nn.Linear default init ranges)
# ---------------------------------------------------------------------------
def _init_linear(key, fan_in, fan_out):
    kw, kb = jax.random.split(key)
    bound = 1.0 / float(fan_in) ** 0.5
    w = jax.random.uniform(kw, (fan_in, fan_out), jnp.float32, -bound, bound)
    b = jax.random.uniform(kb, (fan_out,), jnp.float32, -bound, bound)
    return w, b


def build_params(key, size_in, num_actions, num_shared_layers, shared_layer_size,
                 num_value_layers, value_layer_size, num_adv_layers, adv_layer_size):
    keys = iter(jax.random.split(key, 64))

    shared = [_init_linear(next(keys), size_in, shared_layer_size)]
    for _ in range(num_shared_layers):
        shared.append(_init_linear(next(keys), shared_layer_size, shared_layer_size))

    value = []
    for i in range(num_value_layers):
        fin = shared_layer_size if i < 1 else value_layer_size
        value.append(_init_linear(next(keys), fin, value_layer_size))
    fin = value_layer_size if value else shared_layer_size
    value.append(_init_linear(next(keys), fin, 1))

    adv = []
    for i in range(num_adv_layers):
        fin = shared_layer_size if i < 1 else adv_layer_size
        adv.append(_init_linear(next(keys), fin, adv_layer_size))
    fin = adv_layer_size if adv else shared_layer_size
    adv.append(_init_linear(next(keys), fin, num_actions))

    return shared, value, adv


def reference_forward(x, shared_params, value_params, adv_params,
                      compute_dtype=jnp.bfloat16):
    """Pure-JAX reference: PyTorch structure, kernel-matching precision."""
    f32 = jnp.float32
    q = lambda a: jnp.asarray(a, f32).astype(compute_dtype)

    def lin_relu(h, wb):
        w, b = wb
        y = jnp.dot(q(h), q(w), preferred_element_type=f32) + jnp.asarray(b, f32)
        return jnp.maximum(y, 0.0)

    h = jnp.asarray(x, f32)
    for wb in shared_params:
        h = lin_relu(h, wb)

    v = h
    for wb in value_params[:-1]:
        v = lin_relu(v, wb)
    w, b = value_params[-1]
    v = jnp.maximum(jnp.sum(q(v).astype(f32) * jnp.asarray(w, f32).reshape(1, -1),
                            axis=-1, keepdims=True) + jnp.asarray(b, f32), 0.0)

    a = h
    for wb in adv_params:
        a = lin_relu(a, wb)
    return v + a - jnp.mean(a)


if __name__ == "__main__":
    key = jax.random.PRNGKey(0)
    k_x, k_p, k_x2, k_p2, k_x3, k_p3 = jax.random.split(key, 6)

    # Config 1: typical dueling head.  B=300 fits one 304-row tile -> single
    # grid=(1,) step; exercises stream-head fusion, 32->128 width padding,
    # padded-row masking in the global adv mean, and num_actions -> 128 lanes.
    x = jax.random.normal(k_x, (300, 16), jnp.float32)
    s1, v1, a1 = build_params(k_p, 16, 6, 1, 32, 1, 32, 1, 32)
    q1 = jax.block_until_ready(dueling_dqn_forward(x, s1, v1, a1))
    q1_ref = reference_forward(x, s1, v1, a1)
    assert q1.shape == (300, 6)
    assert jnp.allclose(q1, q1_ref, atol=1e-2, rtol=1e-2), (
        float(jnp.max(jnp.abs(q1 - q1_ref))))

    # Config 2: no value hidden layers / deeper adv stream (unfused path), tiny batch.
    x2 = jax.random.normal(k_x2, (2, 16), jnp.float32)
    s2, v2, a2 = build_params(k_p2, 16, 4, 0, 32, 0, 32, 2, 32)
    q2 = jax.block_until_ready(dueling_dqn_forward(x2, s2, v2, a2))
    q2_ref = reference_forward(x2, s2, v2, a2)
    assert q2.shape == (2, 4)
    assert jnp.allclose(q2, q2_ref, atol=1e-2, rtol=1e-2), (
        float(jnp.max(jnp.abs(q2 - q2_ref))))

    # Config 3: batch spanning 2 tiles -> parallel forward kernel (per-tile adv
    # partial sums) + parallel epilogue kernel; asymmetric stream widths.
    x3 = jax.random.normal(k_x3, (700, 24), jnp.float32)
    s3, v3, a3 = build_params(k_p3, 24, 5, 0, 48, 1, 24, 1, 40)
    q3 = jax.block_until_ready(dueling_dqn_forward(x3, s3, v3, a3))
    q3_ref = reference_forward(x3, s3, v3, a3)
    assert q3.shape == (700, 5)
    assert jnp.allclose(q3, q3_ref, atol=1e-2, rtol=1e-2), (
        float(jnp.max(jnp.abs(q3 - q3_ref))))

    print("KERNEL_OK")
</pallas_src>

<mosaic_0001>
module attributes {stable_mosaic.version = 11 : i64} {
  func.func @kernel(%arg0: i32, %arg1: memref<304x16xbf16, #tpu.memory_space<vmem>>, %arg2: memref<16x128xbf16, #tpu.memory_space<vmem>>, %arg3: memref<1x128xf32, #tpu.memory_space<vmem>>, %arg4: memref<128x128xbf16, #tpu.memory_space<vmem>>, %arg5: memref<1x128xf32, #tpu.memory_space<vmem>>, %arg6: memref<128x256xbf16, #tpu.memory_space<vmem>>, %arg7: memref<1x256xf32, #tpu.memory_space<vmem>>, %arg8: memref<1x256xf32, #tpu.memory_space<vmem>>, %arg9: memref<1x1xf32, #tpu.memory_space<vmem>>, %arg10: memref<256x128xbf16, #tpu.memory_space<vmem>>, %arg11: memref<1x128xf32, #tpu.memory_space<vmem>>, %arg12: memref<304x128xf32, #tpu.memory_space<vmem>>) attributes {dimension_semantics = [#tpu.dimension_semantics<arbitrary>], iteration_bounds = array<i64: 1>, scalar_prefetch = 0 : i64, scratch_operands = 0 : i64, tpu.core_type = #tpu.core_type<tc>, window_params = [{transform_indices = @transform_0, window_bounds = array<i64: 304, 16>}, {pipeline_mode = #tpu.pipeline_mode<synchronous>, transform_indices = @transform_1, window_bounds = array<i64: 16, 128>}, {pipeline_mode = #tpu.pipeline_mode<synchronous>, transform_indices = @transform_2, window_bounds = array<i64: 1, 128>}, {pipeline_mode = #tpu.pipeline_mode<synchronous>, transform_indices = @transform_3, window_bounds = array<i64: 128, 128>}, {pipeline_mode = #tpu.pipeline_mode<synchronous>, transform_indices = @transform_4, window_bounds = array<i64: 1, 128>}, {pipeline_mode = #tpu.pipeline_mode<synchronous>, transform_indices = @transform_5, window_bounds = array<i64: 128, 256>}, {pipeline_mode = #tpu.pipeline_mode<synchronous>, transform_indices = @transform_6, window_bounds = array<i64: 1, 256>}, {pipeline_mode = #tpu.pipeline_mode<synchronous>, transform_indices = @transform_7, window_bounds = array<i64: 1, 256>}, {pipeline_mode = #tpu.pipeline_mode<synchronous>, transform_indices = @transform_8, window_bounds = array<i64: 1, 1>}, {pipeline_mode = #tpu.pipeline_mode<synchronous>, transform_indices = @transform_9, window_bounds = array<i64: 256, 128>}, {pipeline_mode = #tpu.pipeline_mode<synchronous>, transform_indices = @transform_10, window_bounds = array<i64: 1, 128>}, {transform_indices = @transform_11, window_bounds = array<i64: 304, 128>}]} {
    %c0 = arith.constant 0 : index
    %c0_0 = arith.constant 0 : index
    %0 = vector.load %arg1[%c0, %c0_0] : memref<304x16xbf16, #tpu.memory_space<vmem>>, vector<304x16xbf16>
    %c0_1 = arith.constant 0 : index
    %c0_2 = arith.constant 0 : index
    %1 = vector.load %arg2[%c0_1, %c0_2] : memref<16x128xbf16, #tpu.memory_space<vmem>>, vector<16x128xbf16>
    %cst = arith.constant dense<0.000000e+00> : vector<304x128xf32>
    %2 = tpu.matmul %0, %1, %cst {dimension_numbers = #tpu.dot_dimension_numbers<[1], [0], [0], [1], [0, 0, 1, 1], [], []>} : vector<304x16xbf16>, vector<16x128xbf16>, vector<304x128xf32> -> vector<304x128xf32>
    %c0_3 = arith.constant 0 : index
    %c0_4 = arith.constant 0 : index
    %3 = vector.load %arg3[%c0_3, %c0_4] : memref<1x128xf32, #tpu.memory_space<vmem>>, vector<1x128xf32>
    %4 = vector.broadcast %3 : vector<1x128xf32> to vector<304x128xf32>
    %5 = arith.addf %2, %4 : vector<304x128xf32>
    %cst_5 = arith.constant 0.000000e+00 : f32
    %6 = vector.broadcast %cst_5 : f32 to vector<304x128xf32>
    %7 = arith.maximumf %5, %6 : vector<304x128xf32>
    %8 = arith.truncf %7 : vector<304x128xf32> to vector<304x128xbf16>
    %c0_6 = arith.constant 0 : index
    %c0_7 = arith.constant 0 : index
    %9 = vector.load %arg4[%c0_6, %c0_7] : memref<128x128xbf16, #tpu.memory_space<vmem>>, vector<128x128xbf16>
    %cst_8 = arith.constant dense<0.000000e+00> : vector<304x128xf32>
    %10 = tpu.matmul %8, %9, %cst_8 {dimension_numbers = #tpu.dot_dimension_numbers<[1], [0], [0], [1], [0, 0, 1, 1], [], []>} : vector<304x128xbf16>, vector<128x128xbf16>, vector<304x128xf32> -> vector<304x128xf32>
    %c0_9 = arith.constant 0 : index
    %c0_10 = arith.constant 0 : index
    %11 = vector.load %arg5[%c0_9, %c0_10] : memref<1x128xf32, #tpu.memory_space<vmem>>, vector<1x128xf32>
    %12 = vector.broadcast %11 : vector<1x128xf32> to vector<304x128xf32>
    %13 = arith.addf %10, %12 : vector<304x128xf32>
    %cst_11 = arith.constant 0.000000e+00 : f32
    %14 = vector.broadcast %cst_11 : f32 to vector<304x128xf32>
    %15 = arith.maximumf %13, %14 : vector<304x128xf32>
    %16 = arith.truncf %15 : vector<304x128xf32> to vector<304x128xbf16>
    %c0_12 = arith.constant 0 : index
    %c0_13 = arith.constant 0 : index
    %17 = vector.load %arg6[%c0_12, %c0_13] : memref<128x256xbf16, #tpu.memory_space<vmem>>, vector<128x256xbf16>
    %cst_14 = arith.constant dense<0.000000e+00> : vector<304x256xf32>
    %18 = tpu.matmul %16, %17, %cst_14 {dimension_numbers = #tpu.dot_dimension_numbers<[1], [0], [0], [1], [0, 0, 1, 1], [], []>} : vector<304x128xbf16>, vector<128x256xbf16>, vector<304x256xf32> -> vector<304x256xf32>
    %c0_15 = arith.constant 0 : index
    %c0_16 = arith.constant 0 : index
    %19 = vector.load %arg7[%c0_15, %c0_16] : memref<1x256xf32, #tpu.memory_space<vmem>>, vector<1x256xf32>
    %20 = vector.broadcast %19 : vector<1x256xf32> to vector<304x256xf32>
    %21 = arith.addf %18, %20 : vector<304x256xf32>
    %cst_17 = arith.constant 0.000000e+00 : f32
    %22 = vector.broadcast %cst_17 : f32 to vector<304x256xf32>
    %23 = arith.maximumf %21, %22 : vector<304x256xf32>
    %24 = arith.truncf %23 : vector<304x256xf32> to vector<304x256xbf16>
    %25 = arith.extf %24 : vector<304x256xbf16> to vector<304x256xf32>
    %c0_18 = arith.constant 0 : index
    %c0_19 = arith.constant 0 : index
    %26 = vector.load %arg8[%c0_18, %c0_19] : memref<1x256xf32, #tpu.memory_space<vmem>>, vector<1x256xf32>
    %27 = vector.broadcast %26 : vector<1x256xf32> to vector<304x256xf32>
    %28 = arith.mulf %25, %27 : vector<304x256xf32>
    %cst_20 = arith.constant dense<0.000000e+00> : vector<304xf32>
    %29 = vector.multi_reduction <add>, %28, %cst_20 [1] : vector<304x256xf32> to vector<304xf32>
    %30 = vector.shape_cast %29 : vector<304xf32> to vector<304x1xf32>
    %c0_21 = arith.constant 0 : index
    %c0_22 = arith.constant 0 : index
    %31 = vector.load %arg9[%c0_21, %c0_22] : memref<1x1xf32, #tpu.memory_space<vmem>>, vector<1x1xf32>
    %32 = vector.broadcast %31 : vector<1x1xf32> to vector<304x1xf32>
    %33 = arith.addf %30, %32 : vector<304x1xf32>
    %cst_23 = arith.constant 0.000000e+00 : f32
    %34 = vector.broadcast %cst_23 : f32 to vector<304x1xf32>
    %35 = arith.maximumf %33, %34 : vector<304x1xf32>
    %c0_24 = arith.constant 0 : index
    %c0_25 = arith.constant 0 : index
    %36 = vector.load %arg10[%c0_24, %c0_25] : memref<256x128xbf16, #tpu.memory_space<vmem>>, vector<256x128xbf16>
    %cst_26 = arith.constant dense<0.000000e+00> : vector<304x128xf32>
    %37 = tpu.matmul %24, %36, %cst_26 {dimension_numbers = #tpu.dot_dimension_numbers<[1], [0], [0], [1], [0, 0, 1, 1], [], []>} : vector<304x256xbf16>, vector<256x128xbf16>, vector<304x128xf32> -> vector<304x128xf32>
    %c0_27 = arith.constant 0 : index
    %c0_28 = arith.constant 0 : index
    %38 = vector.load %arg11[%c0_27, %c0_28] : memref<1x128xf32, #tpu.memory_space<vmem>>, vector<1x128xf32>
    %39 = vector.broadcast %38 : vector<1x128xf32> to vector<304x128xf32>
    %40 = arith.addf %37, %39 : vector<304x128xf32>
    %cst_29 = arith.constant 0.000000e+00 : f32
    %41 = vector.broadcast %cst_29 : f32 to vector<304x128xf32>
    %42 = arith.maximumf %40, %41 : vector<304x128xf32>
    %43 = vector.broadcast %35 : vector<304x1xf32> to vector<304x128xf32>
    %44 = arith.addf %43, %42 : vector<304x128xf32>
    %45 = tpu.iota {dimensions = array<i32: 0>} : vector<304x128xi32>
    %c300_i32 = arith.constant 300 : i32
    %46 = vector.broadcast %c300_i32 : i32 to vector<304x128xi32>
    %47 = arith.cmpi slt, %45, %46 : vector<304x128xi32>
    %cst_30 = arith.constant 0.000000e+00 : f32
    %48 = vector.broadcast %cst_30 : f32 to vector<304x128xf32>
    %49 = arith.select %47, %42, %48 : vector<304x128xi1>, vector<304x128xf32>
    %50 = vector.shape_cast %49 : vector<304x128xf32> to vector<1x304x128xf32>
    %cst_31 = arith.constant dense<0.000000e+00> : vector<1xf32>
    %51 = vector.multi_reduction <add>, %50, %cst_31 [1, 2] : vector<1x304x128xf32> to vector<1xf32>
    %52 = vector.shape_cast %51 : vector<1xf32> to vector<1x1x1xf32>
    %53 = vector.extract %52[0, 0, 0] : f32 from vector<1x1x1xf32>
    %54 = vector.broadcast %53 : f32 to vector<1x1xf32>
    %cst_32 = arith.constant 5.55555569E-4 : f32
    %55 = vector.broadcast %cst_32 : f32 to vector<1x1xf32>
    %56 = arith.mulf %54, %55 : vector<1x1xf32>
    %57 = vector.broadcast %56 : vector<1x1xf32> to vector<304x128xf32>
    %58 = arith.subf %44, %57 : vector<304x128xf32>
    %c0_33 = arith.constant 0 : index
    %c0_34 = arith.constant 0 : index
    %59 = vector.load %arg12[%c0_33, %c0_34] : memref<304x128xf32, #tpu.memory_space<vmem>>, vector<304x128xf32>
    tpu.vector_store %arg12[%c0_33, %c0_34], %58 {strides = array<i32>} : memref<304x128xf32, #tpu.memory_space<vmem>>, vector<304x128xf32>,
    return
  }
  func.func @transform_0(%arg0: i32) -> (i32, i32) {
    %c0_i32 = arith.constant 0 : i32
    %c0_i32_0 = arith.constant 0 : i32
    return %arg0, %c0_i32 : i32, i32
  }
  func.func @transform_1(%arg0: i32) -> (i32, i32) {
    %c0_i32 = arith.constant 0 : i32
    %c0_i32_0 = arith.constant 0 : i32
    %c0_i32_1 = arith.constant 0 : i32
    return %c0_i32, %c0_i32_0 : i32, i32
  }
  func.func @transform_2(%arg0: i32) -> (i32, i32) {
    %c0_i32 = arith.constant 0 : i32
    %c0_i32_0 = arith.constant 0 : i32
    %c0_i32_1 = arith.constant 0 : i32
    return %c0_i32, %c0_i32_0 : i32, i32
  }
  func.func @transform_3(%arg0: i32) -> (i32, i32) {
    %c0_i32 = arith.constant 0 : i32
    %c0_i32_0 = arith.constant 0 : i32
    %c0_i32_1 = arith.constant 0 : i32
    return %c0_i32, %c0_i32_0 : i32, i32
  }
  func.func @transform_4(%arg0: i32) -> (i32, i32) {
    %c0_i32 = arith.constant 0 : i32
    %c0_i32_0 = arith.constant 0 : i32
    %c0_i32_1 = arith.constant 0 : i32
    return %c0_i32, %c0_i32_0 : i32, i32
  }
  func.func @transform_5(%arg0: i32) -> (i32, i32) {
    %c0_i32 = arith.constant 0 : i32
    %c0_i32_0 = arith.constant 0 : i32
    %c0_i32_1 = arith.constant 0 : i32
    return %c0_i32, %c0_i32_0 : i32, i32
  }
  func.func @transform_6(%arg0: i32) -> (i32, i32) {
    %c0_i32 = arith.constant 0 : i32
    %c0_i32_0 = arith.constant 0 : i32
    %c0_i32_1 = arith.constant 0 : i32
    return %c0_i32, %c0_i32_0 : i32, i32
  }
  func.func @transform_7(%arg0: i32) -> (i32, i32) {
    %c0_i32 = arith.constant 0 : i32
    %c0_i32_0 = arith.constant 0 : i32
    %c0_i32_1 = arith.constant 0 : i32
    return %c0_i32, %c0_i32_0 : i32, i32
  }
  func.func @transform_8(%arg0: i32) -> (i32, i32) {
    %c0_i32 = arith.constant 0 : i32
    %c0_i32_0 = arith.constant 0 : i32
    %c0_i32_1 = arith.constant 0 : i32
    return %c0_i32, %c0_i32_0 : i32, i32
  }
  func.func @transform_9(%arg0: i32) -> (i32, i32) {
    %c0_i32 = arith.constant 0 : i32
    %c0_i32_0 = arith.constant 0 : i32
    %c0_i32_1 = arith.constant 0 : i32
    return %c0_i32, %c0_i32_0 : i32, i32
  }
  func.func @transform_10(%arg0: i32) -> (i32, i32) {
    %c0_i32 = arith.constant 0 : i32
    %c0_i32_0 = arith.constant 0 : i32
    %c0_i32_1 = arith.constant 0 : i32
    return %c0_i32, %c0_i32_0 : i32, i32
  }
  func.func @transform_11(%arg0: i32) -> (i32, i32) {
    %c0_i32 = arith.constant 0 : i32
    %c0_i32_0 = arith.constant 0 : i32
    return %arg0, %c0_i32 : i32, i32
  }
}

</mosaic_0001>

<bundles_post_ra>
// kernel: tpu_custom_call.1
= control target key start
LH: loop header
LB: loop body
LE: loop exit
PB: predicated region body
PF: predicated region fallthrough
CT: control target
= control target key end

     0   :  { %s4137_s0 = inlined_call_operand.vmem [shape: bf16[304,16], index: 0, kind: input, shape index: {}]   ;;  %s4138_s1 = inlined_call_operand.hbm [shape: bf16[16,128], index: 1, kind: input, shape index: {}]   ;;  %s4139_s2 = inlined_call_operand.vmem [shape: f32[1,128], index: 2, kind: input, shape index: {}]   ;;  %s4140_s3 = inlined_call_operand.vmem [shape: bf16[128,128], index: 3, kind: input, shape index: {}]   ;;  %s4141_s4 = inlined_call_operand.vmem [shape: f32[1,128], index: 4, kind: input, shape index: {}]   ;;  %s4142_s5 = inlined_call_operand.vmem [shape: bf16[128,256], index: 5, kind: input, shape index: {}]   ;;  %s4143_s6 = inlined_call_operand.vmem [shape: f32[1,256], index: 6, kind: input, shape index: {}]   ;;  %s4144_s7 = inlined_call_operand.vmem [shape: f32[1,256], index: 7, kind: input, shape index: {}]   ;;  %s4145_s8 = inlined_call_operand.<no memory space> [shape: f32[1,1], index: 8, kind: input, shape index: {}]   ;;  %s4146_s9 = inlined_call_operand.hbm [shape: bf16[256,128], index: 9, kind: input, shape index: {}]   ;;  %s4147_s10 = inlined_call_operand.vmem [shape: f32[1,128], index: 10, kind: input, shape index: {}]   ;;  %s4148_s11 = inlined_call_operand.hbm [shape: f32[304,128], index: 11, kind: output, shape index: {}]  }
   0x1   :  { %v16_v0 = vstv %s4145_s8 }
   0x2   :  { %17 = vst [vmem:[#allocation2] sm:$0x1] %v16_v0 }
   0x3   :  { %18 = vsyncpa [#allocation4], 0 }
   0x4   :  { %19 = vsyncpa [#allocation7], 0 }
   0x5   :  { %20 = vsyncpa [#allocation5], 0  ;;  %s2966_s19 = smov [#allocation3]   ;;  %s2894_s23 = scalar_lea.hbm %s4138_s1, 128 }
   0x6   :  { %s28_s20 = sshll.u32 %s2966_s19, 4  ;;  %p2895_p0 = scmp.ne.s32.totalorder %s4138_s1, %s2894_s23  ;;  %s29_s20 = int_to_ptr.vmem [resolvable:$true] %s28_s20 }
   0x7   :  { %p2898_p1 = scmp.lt.u32.totalorder %s2894_s23, %s4138_s1 }
   0x9   :  { %p2900_p2 = pnand %p2898_p1, %p2895_p0 }
   0xb   :  { %2903 = shalt.err (!%p2900_p2)
}
   0xc   :  { %s2904_s8 = scalar_lea.vmem %s29_s20, 128  ;;  %p2909_p4 = scmp.lt.s32.totalorder %s29_s20, %s29_s20 }
   0xd   :  { %p2905_p3 = scmp.ne.s32.totalorder %s29_s20, %s2904_s8  ;;  %p2910_p5 = scmp.lt.s32.totalorder %s2904_s8, %s2904_s8 }
   0xf   :  { %p2911_p6 = por %p2910_p5, %p2909_p4 }
  0x11   :  { %p2912_p7 = pnand %p2911_p6, %p2905_p3 }
  0x13   :  { %2915 = shalt.err (!%p2912_p7)
}
  0x14   :  { %s2967_s28 = smov 64   ;;  %s2968_s29 = smov 4  }
  0x15   :  { %34 = dma.hbm_to_vmem [thread:$0]  %s4138_s1, 128, %s29_s20, [#allocation4], %s2967_s28, %s2967_s28, %s2968_s29  }
  0x16   :  { %s2969_s13 = smov [#allocation6]   ;;  %s2916_s17 = scalar_lea.hbm %s4146_s9, 2048 }
  0x17   :  { %s54_s14 = sshll.u32 %s2969_s13, 4  ;;  %p2917_p8 = scmp.ne.s32.totalorder %s4146_s9, %s2916_s17  ;;  %s55_s14 = int_to_ptr.vmem [resolvable:$true] %s54_s14 }
  0x18   :  { %p2920_p9 = scmp.lt.u32.totalorder %s2916_s17, %s4146_s9 }
  0x1a   :  { %p2922_p10 = pnand %p2920_p9, %p2917_p8 }
  0x1c   :  { %2925 = shalt.err (!%p2922_p10)
}
  0x1d   :  { %s2926_s23 = scalar_lea.vmem %s55_s14, 2048  ;;  %p2931_p12 = scmp.lt.s32.totalorder %s55_s14, %s55_s14 }
  0x1e   :  { %p2927_p11 = scmp.ne.s32.totalorder %s55_s14, %s2926_s23  ;;  %p2932_p13 = scmp.lt.s32.totalorder %s2926_s23, %s2926_s23 }
  0x20   :  { %p2933_p0 = por %p2932_p13, %p2931_p12 }
  0x22   :  { %p2934_p1 = pnand %p2933_p0, %p2927_p11 }
  0x24   :  { %2937 = shalt.err (!%p2934_p1)
}
  0x25   :  { %60 = dma.hbm_to_vmem [thread:$0]  %s4146_s9, 2048, %s55_s14, [#allocation7], %s2967_s28, %s2967_s28, %s2968_s29  }
  0x26   :  { %2960 = dma.done.wait [#allocation4], 128  }
  0x27   :  { %2961 = vsyncadd [#allocation4], 4294967168 }
  0x28   :  { %2962 = dma.done.wait [#allocation7], 2048  }
  0x29   :  { %2963 = vsyncadd [#allocation7], 4294965248  ;;  %v2970_v1 = vmov 0.0   ;;  %vm2971_vm0 = vmmov 0   ;;  %v2826_v2 = vld [vmem:[#allocation3] sm:$0xff]   ;;  %vm218_vm1 = vcmask 130048  }
  0x2a   :  { %2610 = vmatprep.subr.bf16.mxu0 %v2970_v1  ;;  %2612 = vmatprep.mubr.msk.bf16.mxu0 %vm2971_vm0, %v2970_v1  ;;  %v2827_v3 = vld [vmem:[%s4137_s0] sm:$0xff]   ;;  %v2828_v4 = vld [vmem:[%s4137_s0 + $0x8] sm:$0xff]   ;;  %v2829_v5 = vld [vmem:[%s4137_s0 + $0x10] sm:$0xff]   ;;  %s2973_s20 = smov [#allocation8]  }
  0x2b   :  { %2688 = vmatprep.subr.bf16.mxu1 %v2970_v1  ;;  %2704 = vmatprep.mubr.msk.bf16.mxu1 %vm2971_vm0, %v2970_v1  ;;  %v2846_v6 = vld [vmem:[%s4140_s3] sm:$0xff]   ;;  %v2847_v7 = vld [vmem:[%s4140_s3 + $0x8] sm:$0xff]   ;;  %v2830_v8 = vld [vmem:[%s4137_s0 + $0x18] sm:$0xff]  }
  0x2c   :  { %2611 = vmatpush3.bf16.msra.mxu0 %v2826_v2  ;;  %2689 = vmatpush3.bf16.msra.mxu1 %v2846_v6  ;;  %v2848_v9 = vld [vmem:[%s4140_s3 + $0x10] sm:$0xff]   ;;  %v2849_v10 = vld [vmem:[%s4140_s3 + $0x18] sm:$0xff]   ;;  %v2831_v11 = vld [vmem:[%s4137_s0 + $0x20] sm:$0xff]  }
  0x2d   :  { %2690 = vmatprep.subr.bf16.mxu1 %v2970_v1  ;;  %v2850_v12 = vld [vmem:[%s4140_s3 + $0x20] sm:$0xff]   ;;  %v2851_v13 = vld [vmem:[%s4140_s3 + $0x28] sm:$0xff]   ;;  %v2833_v15 = vld [vmem:[%s4137_s0 + $0x30] sm:$0xff]  }
  0x2e   :  { %v2832_v14 = vld [vmem:[%s4137_s0 + $0x28] sm:$0xff]   ;;  %v2834_v16 = vld [vmem:[%s4137_s0 + $0x38] sm:$0xff]   ;;  %v2835_v17 = vld [vmem:[%s4137_s0 + $0x40] sm:$0xff]  }
  0x2f   :  { %2613 = vmatmul.mubr.msk.bf16.vlgmr.msra.gmra.mrb[0].mxu0 %vm218_vm1, %v2827_v3  ;;  %v2836_v18 = vld [vmem:[%s4137_s0 + $0x48] sm:$0xff]   ;;  %v2837_v19 = vld [vmem:[%s4137_s0 + $0x50] sm:$0xff]   ;;  %v2838_v21 = vld [vmem:[%s4137_s0 + $0x58] sm:$0xff]  }
  0x30   :  { %2616 = vmatprep.mubr.msk.bf16.mxu0 %vm2971_vm0, %v2970_v1  ;;  %2691 = vmatpush3.bf16.msra.mxu1 %v2847_v7  ;;  %v2852_v20 = vld [vmem:[%s4140_s3 + $0x30] sm:$0xff]   ;;  %v2853_v22 = vld [vmem:[%s4140_s3 + $0x38] sm:$0xff]   ;;  %v2839_v23 = vld [vmem:[%s4137_s0 + $0x60] sm:$0xff]   ;;  %s2467_s3 = sshll.u32 %s2973_s20, 4  ;;  %s4114_s3 = int_to_ptr.vmem [resolvable:$true] %s2467_s3 }
  0x31   :  { %2692 = vmatprep.subr.bf16.mxu1 %v2970_v1  ;;  %v2840_v24 = vld [vmem:[%s4137_s0 + $0x68] sm:$0xff]   ;;  %v2841_v25 = vld [vmem:[%s4137_s0 + $0x70] sm:$0xff]   ;;  %v2842_v26 = vld [vmem:[%s4137_s0 + $0x78] sm:$0xff]   ;;  %s2938_s24 = scalar_lea.vmem %s4114_s3, 4864  ;;  %p2943_p3 = scmp.lt.s32.totalorder %s4114_s3, %s4114_s3 }
  0x32   :  { %v2843_v27 = vld [vmem:[%s4137_s0 + $0x80] sm:$0xff]   ;;  %v2844_v28 = vld [vmem:[%s4137_s0 + $0x88] sm:$0xff]   ;;  %v2845_v29 = vld [vmem:[%s4137_s0 + $0x90] sm:$0xff]   ;;  %p2939_p2 = scmp.ne.s32.totalorder %s4114_s3, %s2938_s24  ;;  %p2944_p4 = scmp.lt.s32.totalorder %s2938_s24, %s2938_s24 }
  0x33   :  { %v2854_v30 = vld [vmem:[%s4142_s5] ss:$8 sps:$4 sm:$0xff]   ;;  %v2856_v31 = vld [vmem:[%s4142_s5 + $0x4] ss:$8 sps:$4 sm:$0xff]   ;;  %v2857_v32 = vld [vmem:[%s4142_s5 + $0x10] ss:$8 sps:$4 sm:$0xff]  }
  0x34   :  { %2693 = vmatpush3.bf16.msra.mxu1 %v2848_v9  ;;  %939 = vmatprep.subr.bf16.mxu0 %v2856_v31  ;;  %v2859_v33 = vld [vmem:[%s4142_s5 + $0x14] ss:$8 sps:$4 sm:$0xff]   ;;  %v2860_v34 = vld [vmem:[%s4142_s5 + $0x20] ss:$8 sps:$4 sm:$0xff]   ;;  %v2862_v35 = vld [vmem:[%s4142_s5 + $0x24] ss:$8 sps:$4 sm:$0xff]   ;;  %p2945_p5 = por %p2944_p4, %p2943_p3 }
  0x35   :  { %2694 = vmatprep.subr.bf16.mxu1 %v2970_v1  ;;  %940 = vmatpush1.bf16.msra.mxu0 %v2854_v30  ;;  %v3233_v36 = vld [vmem:[%s4139_s2] ss:$0 sm:$0xff]  ;;  %v2863_v46 = vld [vmem:[%s4142_s5 + $0x30] ss:$8 sps:$4 sm:$0xff]   ;;  %v2865_v47 = vld [vmem:[%s4142_s5 + $0x34] ss:$8 sps:$4 sm:$0xff]  }
  0x36   :  { %941 = vmatprep.subr.bf16.mxu0 %v2859_v33  ;;  %v2866_v3 = vld [vmem:[%s4142_s5 + $0x40] ss:$8 sps:$4 sm:$0xff]   ;;  %p2946_p6 = pnand %p2945_p5, %p2939_p2 }
  0x37   :  { %2617 = vmatmul.mubr.msk.bf16.gmra.mrb[4].mxu0 %vm218_vm1, %v2828_v4  ;;  %v2868_v4 = vld [vmem:[%s4142_s5 + $0x44] ss:$8 sps:$4 sm:$0xff]  }
  0x38   :  { %2620 = vmatprep.mubr.msk.bf16.mxu0 %vm2971_vm0, %v2970_v1  ;;  %2695 = vmatpush3.bf16.msra.mxu1 %v2849_v10  ;;  %v2869_v10 = vld [vmem:[%s4142_s5 + $0x50] ss:$8 sps:$4 sm:$0xff]  }
  0x39   :  { %2696 = vmatprep.subr.bf16.mxu1 %v2970_v1  ;;  %942 = vmatpush1.bf16.msra.mxu0 %v2857_v32 }
  0x3a   :  { %943 = vmatprep.subr.bf16.mxu0 %v2862_v35 }
  0x3c   :  { %2697 = vmatpush3.bf16.msra.mxu1 %v2850_v12 }
  0x3d   :  { %2698 = vmatprep.subr.bf16.mxu1 %v2970_v1  ;;  %944 = vmatpush1.bf16.msra.mxu0 %v2860_v34 }
  0x3e   :  { %945 = vmatprep.subr.bf16.mxu0 %v2865_v47 }
  0x3f   :  { %2621 = vmatmul.mubr.msk.bf16.gmra.mrb[8].mxu0 %vm218_vm1, %v2829_v5 }
  0x40   :  { %2624 = vmatprep.mubr.msk.bf16.mxu0 %vm2971_vm0, %v2970_v1  ;;  %2699 = vmatpush3.bf16.msra.mxu1 %v2851_v13  ;;  %v2874_v13 = vld [vmem:[%s4142_s5 + $0x64] ss:$8 sps:$4 sm:$0xff]  }
  0x41   :  { %2700 = vmatprep.subr.bf16.mxu1 %v2970_v1  ;;  %946 = vmatpush1.bf16.msra.mxu0 %v2863_v46 }
  0x42   :  { %947 = vmatprep.subr.bf16.mxu0 %v2868_v4 }
  0x44   :  { %2701 = vmatpush3.bf16.msra.mxu1 %v2852_v20 }
  0x45   :  { %2702 = vmatprep.subr.bf16.mxu1 %v2970_v1  ;;  %948 = vmatpush1.bf16.msra.mxu0 %v2866_v3 }
  0x47   :  { %2625 = vmatmul.mubr.msk.bf16.gmra.mrb[12].mxu0 %vm218_vm1, %v2830_v8  ;;  %v2871_v8 = vld [vmem:[%s4142_s5 + $0x54] ss:$8 sps:$4 sm:$0xff]  }
  0x48   :  { %2628 = vmatprep.mubr.msk.bf16.mxu0 %vm2971_vm0, %v2970_v1  ;;  %2703 = vmatpush3.bf16.msra.mxu1 %v2853_v22 }
  0x49   :  { %949 = vmatprep.subr.bf16.mxu0 %v2871_v8 }
  0x4a   :  { %950 = vmatpush1.bf16.msra.mxu0 %v2869_v10 }
  0x4b   :  { %951 = vmatprep.subr.bf16.mxu0 %v2874_v13 }
  0x4f   :  { %2629 = vmatmul.mubr.msk.bf16.gmra.mrb[16].mxu0 %vm218_vm1, %v2831_v11 }
  0x50   :  { %2632 = vmatprep.mubr.msk.bf16.mxu0 %vm2971_vm0, %v2970_v1 }
  0x57   :  { %2633 = vmatmul.mubr.msk.bf16.gmra.mrb[20].mxu0 %vm218_vm1, %v2832_v14 }
  0x58   :  { %2636 = vmatprep.mubr.msk.bf16.mxu0 %vm2971_vm0, %v2970_v1 }
  0x5f   :  { %2637 = vmatmul.mubr.msk.bf16.gmra.mrb[24].mxu0 %vm218_vm1, %v2833_v15 }
  0x60   :  { %2640 = vmatprep.mubr.msk.bf16.mxu0 %vm2971_vm0, %v2970_v1 }
  0x67   :  { %2641 = vmatmul.mubr.msk.bf16.gmra.mrb[28].mxu0 %vm218_vm1, %v2834_v16  ;;  %v2872_v16 = vld [vmem:[%s4142_s5 + $0x60] ss:$8 sps:$4 sm:$0xff]  }
  0x68   :  { %2644 = vmatprep.mubr.msk.bf16.mxu0 %vm2971_vm0, %v2970_v1  ;;  %952 = vmatpush1.bf16.msra.mxu0 %v2872_v16 }
  0x6f   :  { %2645 = vmatmul.mubr.msk.bf16.gmra.mrb[32].mxu0 %vm218_vm1, %v2835_v17 }
  0x70   :  { %2648 = vmatprep.mubr.msk.bf16.mxu0 %vm2971_vm0, %v2970_v1 }
  0x77   :  { %2649 = vmatmul.mubr.msk.bf16.gmra.mrb[36].mxu0 %vm218_vm1, %v2836_v18  ;;  %v2877_v18 = vld [vmem:[%s4142_s5 + $0x74] ss:$8 sps:$4 sm:$0xff]  }
  0x78   :  { %2652 = vmatprep.mubr.msk.bf16.mxu0 %vm2971_vm0, %v2970_v1  ;;  %953 = vmatprep.subr.bf16.mxu0 %v2877_v18 }
  0x7f   :  { %2653 = vmatmul.mubr.msk.bf16.gmra.mrb[40].mxu0 %vm218_vm1, %v2837_v19 }
  0x80   :  { %2656 = vmatprep.mubr.msk.bf16.mxu0 %vm2971_vm0, %v2970_v1 }
  0x87   :  { %2657 = vmatmul.mubr.msk.bf16.gmra.mrb[44].mxu0 %vm218_vm1, %v2838_v21 }
  0x88   :  { %2660 = vmatprep.mubr.msk.bf16.mxu0 %vm2971_vm0, %v2970_v1 }
  0x8f   :  { %2661 = vmatmul.mubr.msk.bf16.gmra.mrb[48].mxu0 %vm218_vm1, %v2839_v23  ;;  %v2875_v23 = vld [vmem:[%s4142_s5 + $0x70] ss:$8 sps:$4 sm:$0xff]  }
  0x90   :  { %2664 = vmatprep.mubr.msk.bf16.mxu0 %vm2971_vm0, %v2970_v1  ;;  %954 = vmatpush1.bf16.msra.mxu0 %v2875_v23 }
  0x97   :  { %2665 = vmatmul.mubr.msk.bf16.gmra.mrb[52].mxu0 %vm218_vm1, %v2840_v24 }
  0x98   :  { %2668 = vmatprep.mubr.msk.bf16.mxu0 %vm2971_vm0, %v2970_v1 }
  0x9f   :  { %2669 = vmatmul.mubr.msk.bf16.gmra.mrb[56].mxu0 %vm218_vm1, %v2841_v25 }
  0xa0   :  { %2672 = vmatprep.mubr.msk.bf16.mxu0 %vm2971_vm0, %v2970_v1 }
  0xa7   :  { %2673 = vmatmul.mubr.msk.bf16.gmra.mrb[60].mxu0 %vm218_vm1, %v2842_v26 }
  0xa8   :  { %2676 = vmatprep.mubr.msk.bf16.mxu0 %vm2971_vm0, %v2970_v1 }
  0xaf   :  { %2677 = vmatmul.mubr.msk.bf16.gmra.mrb[64].mxu0 %vm218_vm1, %v2843_v27 }
  0xb0   :  { %2680 = vmatprep.mubr.msk.bf16.mxu0 %vm2971_vm0, %v2970_v1 }
  0xb7   :  { %2681 = vmatmul.mubr.msk.bf16.gmra.mrb[68].mxu0 %vm218_vm1, %v2844_v28 }
  0xb8   :  { %2684 = vmatprep.mubr.msk.bf16.mxu0 %vm2971_vm0, %v2970_v1 }
  0xbf   :  { %2685 = vmatmul.mubr.msk.bf16.gmra.mrb[72].mxu0 %vm218_vm1, %v2845_v29 }
 0x102   :  { %v310_v37 = vpop.f32.mrb[0].mxu0 }
 0x103   :  { %v311_v38 = vadd.f32 %v3233_v36, %v310_v37  ;;  %v2614_v39 = vpop.f32.mrb[1].mxu0 }
 0x104   :  { %v313_v40 = vpop.f32.mrb[2].mxu0 }
 0x105   :  { %v314_v41 = vadd.f32 %v3233_v36, %v313_v40  ;;  %v2615_v42 = vpop.f32.mrb[3].mxu0  ;;  %v461_v43 = vmax.f32 %v311_v38, 0.0 }
 0x107   :  { %v462_v44 = vmax.f32 %v314_v41, 0.0 }
 0x109   :  { %v499_v45 = vpack.c.bf16 %v462_v44, %v461_v43 }
 0x10a   :  { %v318_v48 = vpop.f32.mrb[4].mxu0 }
 0x10b   :  { %v319_v49 = vadd.f32 %v3233_v36, %v318_v48  ;;  %v2618_v50 = vpop.f32.mrb[5].mxu0  ;;  %2705 = vmatmul.mubr.bf16.vlgmr.msra.gmra.mrb[0].mxu1 %v499_v45 }
 0x10c   :  { %v321_v51 = vpop.f32.mrb[6].mxu0  ;;  %2708 = vmatprep.mubr.msk.bf16.mxu1 %vm2971_vm0, %v2970_v1 }
 0x10d   :  { %v322_v52 = vadd.f32 %v3233_v36, %v321_v51  ;;  %v2619_v53 = vpop.f32.mrb[7].mxu0  ;;  %v463_v54 = vmax.f32 %v319_v49, 0.0 }
 0x10f   :  { %v464_v55 = vmax.f32 %v322_v52, 0.0 }
 0x111   :  { %v500_v56 = vpack.c.bf16 %v464_v55, %v463_v54 }
 0x112   :  { %v326_v57 = vpop.f32.mrb[8].mxu0 }
 0x113   :  { %v327_v58 = vadd.f32 %v3233_v36, %v326_v57  ;;  %v2622_v59 = vpop.f32.mrb[9].mxu0  ;;  %2709 = vmatmul.mubr.bf16.gmra.mrb[4].mxu1 %v500_v56 }
 0x114   :  { %v329_v60 = vpop.f32.mrb[10].mxu0  ;;  %2712 = vmatprep.mubr.msk.bf16.mxu1 %vm2971_vm0, %v2970_v1 }
 0x115   :  { %v330_v61 = vadd.f32 %v3233_v36, %v329_v60  ;;  %v2623_v62 = vpop.f32.mrb[11].mxu0  ;;  %v465_v63 = vmax.f32 %v327_v58, 0.0 }
 0x117   :  { %v466_v0 = vmax.f32 %v330_v61, 0.0 }
 0x119   :  { %v501_v2 = vpack.c.bf16 %v466_v0, %v465_v63 }
 0x11a   :  { %v334_v5 = vpop.f32.mrb[12].mxu0 }
 0x11b   :  { %v335_v6 = vadd.f32 %v3233_v36, %v334_v5  ;;  %v2626_v7 = vpop.f32.mrb[13].mxu0  ;;  %2713 = vmatmul.mubr.bf16.gmra.mrb[8].mxu1 %v501_v2 }
 0x11c   :  { %v337_v9 = vpop.f32.mrb[14].mxu0  ;;  %2716 = vmatprep.mubr.msk.bf16.mxu1 %vm2971_vm0, %v2970_v1 }
 0x11d   :  { %v338_v11 = vadd.f32 %v3233_v36, %v337_v9  ;;  %v2627_v12 = vpop.f32.mrb[15].mxu0  ;;  %v467_v14 = vmax.f32 %v335_v6, 0.0 }
 0x11f   :  { %v468_v15 = vmax.f32 %v338_v11, 0.0 }
 0x121   :  { %v502_v17 = vpack.c.bf16 %v468_v15, %v467_v14 }
 0x122   :  { %v342_v19 = vpop.f32.mrb[16].mxu0 }
 0x123   :  { %v343_v20 = vadd.f32 %v3233_v36, %v342_v19  ;;  %v2630_v21 = vpop.f32.mrb[17].mxu0  ;;  %2717 = vmatmul.mubr.bf16.gmra.mrb[12].mxu1 %v502_v17 }
 0x124   :  { %v345_v22 = vpop.f32.mrb[18].mxu0  ;;  %2720 = vmatprep.mubr.msk.bf16.mxu1 %vm2971_vm0, %v2970_v1 }
 0x125   :  { %v346_v24 = vadd.f32 %v3233_v36, %v345_v22  ;;  %v2631_v25 = vpop.f32.mrb[19].mxu0  ;;  %v469_v26 = vmax.f32 %v343_v20, 0.0 }
 0x127   :  { %v470_v27 = vmax.f32 %v346_v24, 0.0 }
 0x129   :  { %v503_v28 = vpack.c.bf16 %v470_v27, %v469_v26 }
 0x12a   :  { %v350_v29 = vpop.f32.mrb[20].mxu0 }
 0x12b   :  { %v351_v30 = vadd.f32 %v3233_v36, %v350_v29  ;;  %v2634_v31 = vpop.f32.mrb[21].mxu0  ;;  %2721 = vmatmul.mubr.bf16.gmra.mrb[16].mxu1 %v503_v28 }
 0x12c   :  { %v353_v32 = vpop.f32.mrb[22].mxu0  ;;  %2724 = vmatprep.mubr.msk.bf16.mxu1 %vm2971_vm0, %v2970_v1 }
 0x12d   :  { %v354_v33 = vadd.f32 %v3233_v36, %v353_v32  ;;  %v2635_v34 = vpop.f32.mrb[23].mxu0  ;;  %v471_v35 = vmax.f32 %v351_v30, 0.0 }
 0x12f   :  { %v472_v37 = vmax.f32 %v354_v33, 0.0 }
 0x131   :  { %v504_v38 = vpack.c.bf16 %v472_v37, %v471_v35  ;;  %v2972_v37 = vmov 0  }
 0x132   :  { %v358_v39 = vpop.f32.mrb[24].mxu0  ;;  %971 = vmatprep.mubr.bf16.mxu0 %v2972_v37  ;;  %2780 = vmatprep.subr.bf16.mxu1 %v2972_v37 }
 0x133   :  { %v359_v40 = vadd.f32 %v3233_v36, %v358_v39  ;;  %v2638_v41 = vpop.f32.mrb[25].mxu0  ;;  %2725 = vmatmul.mubr.bf16.gmra.mrb[20].mxu1 %v504_v38  ;;  %1772 = vmatprep.subr.bf16.mxu0 %v2972_v37 }
 0x134   :  { %v361_v42 = vpop.f32.mrb[26].mxu0  ;;  %2728 = vmatprep.mubr.msk.bf16.mxu1 %vm2971_vm0, %v2970_v1  ;;  %2825 = vset.pattern.permute.xlu1 %v2972_v37 }
 0x135   :  { %v362_v43 = vadd.f32 %v3233_v36, %v361_v42  ;;  %v2639_v44 = vpop.f32.mrb[27].mxu0  ;;  %v473_v45 = vmax.f32 %v359_v40, 0.0  ;;  %2824 = vset.pattern.permute.xlu0 %v2972_v37 }
 0x137   :  { %v474_v46 = vmax.f32 %v362_v43, 0.0 }
 0x139   :  { %v505_v47 = vpack.c.bf16 %v474_v46, %v473_v45 }
 0x13a   :  { %v366_v48 = vpop.f32.mrb[28].mxu0 }
 0x13b   :  { %v367_v49 = vadd.f32 %v3233_v36, %v366_v48  ;;  %v2642_v50 = vpop.f32.mrb[29].mxu0  ;;  %2729 = vmatmul.mubr.bf16.gmra.mrb[24].mxu1 %v505_v47 }
 0x13c   :  { %v369_v51 = vpop.f32.mrb[30].mxu0  ;;  %2732 = vmatprep.mubr.msk.bf16.mxu1 %vm2971_vm0, %v2970_v1 }
 0x13d   :  { %v370_v52 = vadd.f32 %v3233_v36, %v369_v51  ;;  %v2643_v53 = vpop.f32.mrb[31].mxu0  ;;  %v475_v54 = vmax.f32 %v367_v49, 0.0 }
 0x13f   :  { %v476_v55 = vmax.f32 %v370_v52, 0.0 }
 0x141   :  { %v506_v56 = vpack.c.bf16 %v476_v55, %v475_v54 }
 0x142   :  { %v374_v57 = vpop.f32.mrb[32].mxu0 }
 0x143   :  { %v375_v58 = vadd.f32 %v3233_v36, %v374_v57  ;;  %v2646_v59 = vpop.f32.mrb[33].mxu0  ;;  %2733 = vmatmul.mubr.bf16.gmra.mrb[28].mxu1 %v506_v56 }
 0x144   :  { %v377_v60 = vpop.f32.mrb[34].mxu0  ;;  %2736 = vmatprep.mubr.msk.bf16.mxu1 %vm2971_vm0, %v2970_v1 }
 0x145   :  { %v378_v61 = vadd.f32 %v3233_v36, %v377_v60  ;;  %v2647_v62 = vpop.f32.mrb[35].mxu0  ;;  %v477_v63 = vmax.f32 %v375_v58, 0.0 }
 0x147   :  { %v478_v0 = vmax.f32 %v378_v61, 0.0 }
 0x149   :  { %v507_v2 = vpack.c.bf16 %v478_v0, %v477_v63 }
 0x14a   :  { %v382_v3 = vpop.f32.mrb[36].mxu0 }
 0x14b   :  { %v383_v4 = vadd.f32 %v3233_v36, %v382_v3  ;;  %v2650_v5 = vpop.f32.mrb[37].mxu0  ;;  %2737 = vmatmul.mubr.bf16.gmra.mrb[32].mxu1 %v507_v2 }
 0x14c   :  { %v385_v6 = vpop.f32.mrb[38].mxu0  ;;  %2740 = vmatprep.mubr.msk.bf16.mxu1 %vm2971_vm0, %v2970_v1 }
 0x14d   :  { %v386_v7 = vadd.f32 %v3233_v36, %v385_v6  ;;  %v2651_v8 = vpop.f32.mrb[39].mxu0  ;;  %v479_v9 = vmax.f32 %v383_v4, 0.0 }
 0x14f   :  { %v480_v10 = vmax.f32 %v386_v7, 0.0 }
 0x151   :  { %v508_v11 = vpack.c.bf16 %v480_v10, %v479_v9 }
 0x152   :  { %v390_v12 = vpop.f32.mrb[40].mxu0 }
 0x153   :  { %v391_v13 = vadd.f32 %v3233_v36, %v390_v12  ;;  %v2654_v14 = vpop.f32.mrb[41].mxu0  ;;  %2741 = vmatmul.mubr.bf16.gmra.mrb[36].mxu1 %v508_v11 }
 0x154   :  { %v393_v15 = vpop.f32.mrb[42].mxu0  ;;  %2744 = vmatprep.mubr.msk.bf16.mxu1 %vm2971_vm0, %v2970_v1 }
 0x155   :  { %v394_v16 = vadd.f32 %v3233_v36, %v393_v15  ;;  %v2655_v17 = vpop.f32.mrb[43].mxu0  ;;  %v481_v18 = vmax.f32 %v391_v13, 0.0 }
 0x157   :  { %v482_v19 = vmax.f32 %v394_v16, 0.0 }
 0x159   :  { %v509_v20 = vpack.c.bf16 %v482_v19, %v481_v18 }
 0x15a   :  { %v398_v21 = vpop.f32.mrb[44].mxu0 }
 0x15b   :  { %v399_v22 = vadd.f32 %v3233_v36, %v398_v21  ;;  %v2658_v23 = vpop.f32.mrb[45].mxu0  ;;  %2745 = vmatmul.mubr.bf16.gmra.mrb[40].mxu1 %v509_v20 }
 0x15c   :  { %v401_v24 = vpop.f32.mrb[46].mxu0  ;;  %2748 = vmatprep.mubr.msk.bf16.mxu1 %vm2971_vm0, %v2970_v1 }
 0x15d   :  { %v402_v25 = vadd.f32 %v3233_v36, %v401_v24  ;;  %v2659_v26 = vpop.f32.mrb[47].mxu0  ;;  %v483_v27 = vmax.f32 %v399_v22, 0.0 }
 0x15f   :  { %v484_v28 = vmax.f32 %v402_v25, 0.0 }
 0x161   :  { %v510_v29 = vpack.c.bf16 %v484_v28, %v483_v27 }
 0x162   :  { %v406_v30 = vpop.f32.mrb[48].mxu0 }
 0x163   :  { %v407_v31 = vadd.f32 %v3233_v36, %v406_v30  ;;  %v2662_v32 = vpop.f32.mrb[49].mxu0  ;;  %2749 = vmatmul.mubr.bf16.gmra.mrb[44].mxu1 %v510_v29 }
 0x164   :  { %v409_v33 = vpop.f32.mrb[50].mxu0  ;;  %2752 = vmatprep.mubr.msk.bf16.mxu1 %vm2971_vm0, %v2970_v1  ;;  %v2878_v32 = vld [vmem:[#allocation6] sm:$0xff]  }
 0x165   :  { %v410_v34 = vadd.f32 %v3233_v36, %v409_v33  ;;  %v2663_v35 = vpop.f32.mrb[51].mxu0  ;;  %v485_v38 = vmax.f32 %v407_v31, 0.0  ;;  %2796 = vmatpush1.bf16.msra.mxu1 %v2878_v32  ;;  %v2879_v33 = vld [vmem:[#allocation6 + $0x8] sm:$0xff]  }
 0x166   :  { %2781 = vmatprep.subr.bf16.mxu1 %v2972_v37  ;;  %v2882_v35 = vld [vmem:[#allocation6 + $0x20] sm:$0xff]  }
 0x167   :  { %v486_v39 = vmax.f32 %v410_v34, 0.0  ;;  %v2880_v34 = vld [vmem:[#allocation6 + $0x10] sm:$0xff]  }
 0x169   :  { %v511_v40 = vpack.c.bf16 %v486_v39, %v485_v38  ;;  %2797 = vmatpush1.bf16.msra.mxu1 %v2879_v33 }
 0x16a   :  { %v414_v41 = vpop.f32.mrb[52].mxu0  ;;  %2782 = vmatprep.subr.bf16.mxu1 %v2972_v37 }
 0x16b   :  { %v415_v42 = vadd.f32 %v3233_v36, %v414_v41  ;;  %v2666_v43 = vpop.f32.mrb[53].mxu0  ;;  %2753 = vmatmul.mubr.bf16.gmra.mrb[48].mxu1 %v511_v40 }
 0x16c   :  { %v417_v44 = vpop.f32.mrb[54].mxu0  ;;  %2756 = vmatprep.mubr.msk.bf16.mxu1 %vm2971_vm0, %v2970_v1 }
 0x16d   :  { %v418_v45 = vadd.f32 %v3233_v36, %v417_v44  ;;  %v2667_v46 = vpop.f32.mrb[55].mxu0  ;;  %v487_v47 = vmax.f32 %v415_v42, 0.0  ;;  %2798 = vmatpush1.bf16.msra.mxu1 %v2880_v34 }
 0x16e   :  { %2783 = vmatprep.subr.bf16.mxu1 %v2972_v37 }
 0x16f   :  { %v488_v48 = vmax.f32 %v418_v45, 0.0 }
 0x171   :  { %v512_v49 = vpack.c.bf16 %v488_v48, %v487_v47  ;;  %v2883_v47 = vld [vmem:[#allocation6 + $0x28] sm:$0xff]  }
 0x172   :  { %v422_v50 = vpop.f32.mrb[56].mxu0 }
 0x173   :  { %v423_v51 = vadd.f32 %v3233_v36, %v422_v50  ;;  %v2670_v52 = vpop.f32.mrb[57].mxu0  ;;  %2757 = vmatmul.mubr.bf16.gmra.mrb[52].mxu1 %v512_v49 }
 0x174   :  { %v425_v53 = vpop.f32.mrb[58].mxu0  ;;  %2760 = vmatprep.mubr.msk.bf16.mxu1 %vm2971_vm0, %v2970_v1 }
 0x175   :  { %v426_v54 = vadd.f32 %v3233_v36, %v425_v53  ;;  %v2671_v55 = vpop.f32.mrb[59].mxu0  ;;  %v489_v56 = vmax.f32 %v423_v51, 0.0 }
 0x177   :  { %v490_v57 = vmax.f32 %v426_v54, 0.0 }
 0x179   :  { %v513_v58 = vpack.c.bf16 %v490_v57, %v489_v56 }
 0x17a   :  { %v430_v59 = vpop.f32.mrb[60].mxu0 }
 0x17b   :  { %v431_v60 = vadd.f32 %v3233_v36, %v430_v59  ;;  %v2674_v61 = vpop.f32.mrb[61].mxu0  ;;  %2761 = vmatmul.mubr.bf16.gmra.mrb[56].mxu1 %v513_v58 }
 0x17c   :  { %v433_v62 = vpop.f32.mrb[62].mxu0  ;;  %2764 = vmatprep.mubr.msk.bf16.mxu1 %vm2971_vm0, %v2970_v1 }
 0x17d   :  { %v434_v63 = vadd.f32 %v3233_v36, %v433_v62  ;;  %v2675_v0 = vpop.f32.mrb[63].mxu0  ;;  %v491_v2 = vmax.f32 %v431_v60, 0.0 }
 0x17f   :  { %v492_v3 = vmax.f32 %v434_v63, 0.0  ;;  %v2884_v63 = vld [vmem:[#allocation6 + $0x30] sm:$0xff]  }
 0x181   :  { %v514_v4 = vpack.c.bf16 %v492_v3, %v491_v2 }
 0x182   :  { %v438_v5 = vpop.f32.mrb[64].mxu0 }
 0x183   :  { %v439_v6 = vadd.f32 %v3233_v36, %v438_v5  ;;  %v2678_v7 = vpop.f32.mrb[65].mxu0  ;;  %2765 = vmatmul.mubr.bf16.gmra.mrb[60].mxu1 %v514_v4 }
 0x184   :  { %v441_v8 = vpop.f32.mrb[66].mxu0  ;;  %2768 = vmatprep.mubr.msk.bf16.mxu1 %vm2971_vm0, %v2970_v1  ;;  %v2885_v7 = vld [vmem:[#allocation6 + $0x38] sm:$0xff]  }
 0x185   :  { %v442_v9 = vadd.f32 %v3233_v36, %v441_v8  ;;  %v2679_v10 = vpop.f32.mrb[67].mxu0  ;;  %v493_v11 = vmax.f32 %v439_v6, 0.0 }
 0x187   :  { %v494_v12 = vmax.f32 %v442_v9, 0.0 }
 0x189   :  { %v515_v13 = vpack.c.bf16 %v494_v12, %v493_v11 }
 0x18a   :  { %v446_v14 = vpop.f32.mrb[68].mxu0 }
 0x18b   :  { %v447_v15 = vadd.f32 %v3233_v36, %v446_v14  ;;  %v2682_v16 = vpop.f32.mrb[69].mxu0  ;;  %2769 = vmatmul.mubr.bf16.gmra.mrb[64].mxu1 %v515_v13  ;;  %v2886_v13 = vld [vmem:[#allocation6 + $0x40] sm:$0xff]  }
 0x18c   :  { %v449_v17 = vpop.f32.mrb[70].mxu0  ;;  %2772 = vmatprep.mubr.msk.bf16.mxu1 %vm2971_vm0, %v2970_v1 }
 0x18d   :  { %v450_v18 = vadd.f32 %v3233_v36, %v449_v17  ;;  %v2683_v19 = vpop.f32.mrb[71].mxu0  ;;  %v495_v20 = vmax.f32 %v447_v15, 0.0 }
 0x18f   :  { %v496_v21 = vmax.f32 %v450_v18, 0.0  ;;  %v2887_v18 = vld [vmem:[#allocation6 + $0x48] sm:$0xff]  }
 0x191   :  { %v516_v22 = vpack.c.bf16 %v496_v21, %v495_v20 }
 0x192   :  { %v454_v23 = vpop.f32.mrb[72].mxu0 }
 0x193   :  { %v455_v24 = vadd.f32 %v3233_v36, %v454_v23  ;;  %v2686_v25 = vpop.f32.mrb[73].mxu0  ;;  %2773 = vmatmul.mubr.bf16.gmra.mrb[68].mxu1 %v516_v22 }
 0x194   :  { %v457_v26 = vpop.f32.mrb[74].mxu0  ;;  %2776 = vmatprep.mubr.msk.bf16.mxu1 %vm2971_vm0, %v2970_v1  ;;  %v2881_v1 = vld [vmem:[#allocation6 + $0x18] sm:$0xff]  }
 0x195   :  { %v458_v27 = vadd.f32 %v3233_v36, %v457_v26  ;;  %v2687_v28 = vpop.f32.mrb[75].mxu0  ;;  %v497_v29 = vmax.f32 %v455_v24, 0.0  ;;  %2799 = vmatpush1.bf16.msra.mxu1 %v2881_v1  ;;  %v3351_v36 = vld [vmem:[%s4141_s4] ss:$0 sm:$0xff] }
 0x196   :  { %2784 = vmatprep.subr.bf16.mxu1 %v2972_v37  ;;  %v2888_v24 = vld [vmem:[#allocation6 + $0x50] sm:$0xff]  }
 0x197   :  { %v498_v30 = vmax.f32 %v458_v27, 0.0 }
 0x199   :  { %v517_v31 = vpack.c.bf16 %v498_v30, %v497_v29  ;;  %2800 = vmatpush1.bf16.msra.mxu1 %v2882_v35  ;;  %v2889_v29 = vld [vmem:[#allocation6 + $0x58] sm:$0xff]  }
 0x19a   :  { %2785 = vmatprep.subr.bf16.mxu1 %v2972_v37 }
 0x19b   :  { %2777 = vmatmul.mubr.bf16.gmra.mrb[72].mxu1 %v517_v31 }
 0x19d   :  { %2801 = vmatpush1.bf16.msra.mxu1 %v2883_v47 }
 0x19e   :  { %2786 = vmatprep.subr.bf16.mxu1 %v2972_v37 }
 0x1a1   :  { %2802 = vmatpush1.bf16.msra.mxu1 %v2884_v63 }
 0x1a2   :  { %2787 = vmatprep.subr.bf16.mxu1 %v2972_v37 }
 0x1a5   :  { %2803 = vmatpush1.bf16.msra.mxu1 %v2885_v7 }
 0x1a6   :  { %2788 = vmatprep.subr.bf16.mxu1 %v2972_v37 }
 0x1a9   :  { %2804 = vmatpush1.bf16.msra.mxu1 %v2886_v13 }
 0x1aa   :  { %2789 = vmatprep.subr.bf16.mxu1 %v2972_v37 }
 0x1ad   :  { %2805 = vmatpush1.bf16.msra.mxu1 %v2887_v18 }
 0x1ae   :  { %2790 = vmatprep.subr.bf16.mxu1 %v2972_v37 }
 0x1b1   :  { %2806 = vmatpush1.bf16.msra.mxu1 %v2888_v24 }
 0x1b2   :  { %2791 = vmatprep.subr.bf16.mxu1 %v2972_v37 }
 0x1b5   :  { %2807 = vmatpush1.bf16.msra.mxu1 %v2889_v29 }
 0x1b6   :  { %2792 = vmatprep.subr.bf16.mxu1 %v2972_v37 }
 0x1de   :  { %v623_v38 = vpop.f32.mrb[0].mxu1 }
 0x1df   :  { %v624_v39 = vadd.f32 %v3351_v36, %v623_v38  ;;  %v2706_v40 = vpop.f32.mrb[1].mxu1 }
 0x1e0   :  { %v626_v41 = vpop.f32.mrb[2].mxu1 }
 0x1e1   :  { %v627_v42 = vadd.f32 %v3351_v36, %v626_v41  ;;  %v2707_v43 = vpop.f32.mrb[3].mxu1  ;;  %v774_v44 = vmax.f32 %v624_v39, 0.0  ;;  %v2891_v41 = vld [vmem:[#allocation6 + $0x68] sm:$0xff]  }
 0x1e3   :  { %v775_v45 = vmax.f32 %v627_v42, 0.0 }
 0x1e5   :  { %v812_v46 = vpack.c.bf16 %v775_v45, %v774_v44 }
 0x1e6   :  { %v631_v48 = vpop.f32.mrb[4].mxu1 }
 0x1e7   :  { %v632_v49 = vadd.f32 %v3351_v36, %v631_v48  ;;  %v2710_v50 = vpop.f32.mrb[5].mxu1  ;;  %972 = vmatmul.mubr.bf16.vlgmr.msra.gmra.mrb[76].mxu0 %v812_v46 }
 0x1e8   :  { %v634_v51 = vpop.f32.mrb[6].mxu1  ;;  %981 = vmatprep.mubr.bf16.mxu0 %v2972_v37  ;;  %1773 = vmatpush1.bf16.msra.mxu0 %v2878_v32 }
 0x1e9   :  { %v635_v52 = vadd.f32 %v3351_v36, %v634_v51  ;;  %v2711_v53 = vpop.f32.mrb[7].mxu1  ;;  %1774 = vmatprep.subr.bf16.mxu0 %v2972_v37  ;;  %v776_v54 = vmax.f32 %v632_v49, 0.0 }
 0x1eb   :  { %v777_v55 = vmax.f32 %v635_v52, 0.0 }
 0x1ec   :  { %1775 = vmatpush1.bf16.msra.mxu0 %v2879_v33 }
 0x1ed   :  { %v813_v56 = vpack.c.bf16 %v777_v55, %v776_v54  ;;  %1776 = vmatprep.subr.bf16.mxu0 %v2972_v37 }
 0x1ee   :  { %v639_v57 = vpop.f32.mrb[8].mxu1 }
 0x1ef   :  { %v640_v58 = vadd.f32 %v3351_v36, %v639_v57  ;;  %v2714_v59 = vpop.f32.mrb[9].mxu1  ;;  %982 = vmatmul.mubr.bf16.gmra.mrb[80].mxu0 %v813_v56 }
 0x1f0   :  { %v642_v60 = vpop.f32.mrb[10].mxu1  ;;  %991 = vmatprep.mubr.bf16.mxu0 %v2972_v37  ;;  %1777 = vmatpush1.bf16.msra.mxu0 %v2880_v34 }
 0x1f1   :  { %v643_v61 = vadd.f32 %v3351_v36, %v642_v60  ;;  %v2715_v62 = vpop.f32.mrb[11].mxu1  ;;  %1778 = vmatprep.subr.bf16.mxu0 %v2972_v37  ;;  %v778_v0 = vmax.f32 %v640_v58, 0.0 }
 0x1f3   :  { %v779_v2 = vmax.f32 %v643_v61, 0.0 }
 0x1f4   :  { %1779 = vmatpush1.bf16.msra.mxu0 %v2881_v1  ;;  %v2890_v1 = vld [vmem:[#allocation6 + $0x60] sm:$0xff]  }
 0x1f5   :  { %v814_v3 = vpack.c.bf16 %v779_v2, %v778_v0  ;;  %1780 = vmatprep.subr.bf16.mxu0 %v2972_v37  ;;  %2808 = vmatpush1.bf16.msra.mxu1 %v2890_v1 }
 0x1f6   :  { %v647_v4 = vpop.f32.mrb[12].mxu1  ;;  %2793 = vmatprep.subr.bf16.mxu1 %v2972_v37 }
 0x1f7   :  { %v648_v5 = vadd.f32 %v3351_v36, %v647_v4  ;;  %v2718_v6 = vpop.f32.mrb[13].mxu1  ;;  %992 = vmatmul.mubr.bf16.gmra.mrb[84].mxu0 %v814_v3 }
 0x1f8   :  { %v650_v8 = vpop.f32.mrb[14].mxu1  ;;  %1001 = vmatprep.mubr.bf16.mxu0 %v2972_v37  ;;  %1781 = vmatpush1.bf16.msra.mxu0 %v2882_v35 }
 0x1f9   :  { %v651_v9 = vadd.f32 %v3351_v36, %v650_v8  ;;  %v2719_v10 = vpop.f32.mrb[15].mxu1  ;;  %1782 = vmatprep.subr.bf16.mxu0 %v2972_v37  ;;  %v780_v11 = vmax.f32 %v648_v5, 0.0  ;;  %2809 = vmatpush1.bf16.msra.mxu1 %v2891_v41 }
 0x1fa   :  { %2794 = vmatprep.subr.bf16.mxu1 %v2972_v37 }
 0x1fb   :  { %v781_v12 = vmax.f32 %v651_v9, 0.0 }
 0x1fc   :  { %1783 = vmatpush1.bf16.msra.mxu0 %v2883_v47 }
 0x1fd   :  { %v815_v14 = vpack.c.bf16 %v781_v12, %v780_v11  ;;  %1784 = vmatprep.subr.bf16.mxu0 %v2972_v37 }
 0x1fe   :  { %v655_v15 = vpop.f32.mrb[16].mxu1 }
 0x1ff   :  { %v656_v16 = vadd.f32 %v3351_v36, %v655_v15  ;;  %v2722_v17 = vpop.f32.mrb[17].mxu1  ;;  %1002 = vmatmul.mubr.bf16.gmra.mrb[88].mxu0 %v815_v14 }
 0x200   :  { %v658_v19 = vpop.f32.mrb[18].mxu1  ;;  %1011 = vmatprep.mubr.bf16.mxu0 %v2972_v37  ;;  %1785 = vmatpush1.bf16.msra.mxu0 %v2884_v63 }
 0x201   :  { %v659_v20 = vadd.f32 %v3351_v36, %v658_v19  ;;  %v2723_v21 = vpop.f32.mrb[19].mxu1  ;;  %1786 = vmatprep.subr.bf16.mxu0 %v2972_v37  ;;  %v782_v22 = vmax.f32 %v656_v16, 0.0 }
 0x203   :  { %v783_v23 = vmax.f32 %v659_v20, 0.0 }
 0x204   :  { %1787 = vmatpush1.bf16.msra.mxu0 %v2885_v7 }
 0x205   :  { %v816_v25 = vpack.c.bf16 %v783_v23, %v782_v22  ;;  %1788 = vmatprep.subr.bf16.mxu0 %v2972_v37 }
 0x206   :  { %v663_v26 = vpop.f32.mrb[20].mxu1 }
 0x207   :  { %v664_v27 = vadd.f32 %v3351_v36, %v663_v26  ;;  %v2726_v28 = vpop.f32.mrb[21].mxu1  ;;  %1012 = vmatmul.mubr.bf16.gmra.mrb[92].mxu0 %v816_v25 }
 0x208   :  { %v666_v30 = vpop.f32.mrb[22].mxu1  ;;  %1021 = vmatprep.mubr.bf16.mxu0 %v2972_v37  ;;  %1789 = vmatpush1.bf16.msra.mxu0 %v2886_v13 }
 0x209   :  { %v667_v31 = vadd.f32 %v3351_v36, %v666_v30  ;;  %v2727_v32 = vpop.f32.mrb[23].mxu1  ;;  %1790 = vmatprep.subr.bf16.mxu0 %v2972_v37  ;;  %v784_v33 = vmax.f32 %v664_v27, 0.0 }
 0x20b   :  { %v785_v34 = vmax.f32 %v667_v31, 0.0 }
 0x20c   :  { %1791 = vmatpush1.bf16.msra.mxu0 %v2887_v18 }
 0x20d   :  { %v817_v35 = vpack.c.bf16 %v785_v34, %v784_v33  ;;  %1792 = vmatprep.subr.bf16.mxu0 %v2972_v37 }
 0x20e   :  { %v671_v38 = vpop.f32.mrb[24].mxu1 }
 0x20f   :  { %v672_v39 = vadd.f32 %v3351_v36, %v671_v38  ;;  %v2730_v40 = vpop.f32.mrb[25].mxu1  ;;  %1022 = vmatmul.mubr.bf16.gmra.mrb[96].mxu0 %v817_v35 }
 0x210   :  { %v674_v42 = vpop.f32.mrb[26].mxu1  ;;  %1031 = vmatprep.mubr.bf16.mxu0 %v2972_v37  ;;  %1793 = vmatpush1.bf16.msra.mxu0 %v2888_v24 }
 0x211   :  { %v675_v43 = vadd.f32 %v3351_v36, %v674_v42  ;;  %v2731_v44 = vpop.f32.mrb[27].mxu1  ;;  %1794 = vmatprep.subr.bf16.mxu0 %v2972_v37  ;;  %v786_v45 = vmax.f32 %v672_v39, 0.0 }
 0x213   :  { %v787_v46 = vmax.f32 %v675_v43, 0.0 }
 0x214   :  { %1795 = vmatpush1.bf16.msra.mxu0 %v2889_v29  ;;  %v2892_v29 = vld [vmem:[#allocation6 + $0x70] sm:$0xff]  }
 0x215   :  { %v818_v47 = vpack.c.bf16 %v787_v46, %v786_v45  ;;  %1796 = vmatprep.subr.bf16.mxu0 %v2972_v37  ;;  %2810 = vmatpush1.bf16.msra.mxu1 %v2892_v29 }
 0x216   :  { %v679_v48 = vpop.f32.mrb[28].mxu1  ;;  %2795 = vmatprep.subr.bf16.mxu1 %v2972_v37 }
 0x217   :  { %v680_v49 = vadd.f32 %v3351_v36, %v679_v48  ;;  %v2734_v50 = vpop.f32.mrb[29].mxu1  ;;  %1032 = vmatmul.mubr.bf16.gmra.mrb[100].mxu0 %v818_v47 }
 0x218   :  { %v682_v51 = vpop.f32.mrb[30].mxu1  ;;  %1041 = vmatprep.mubr.bf16.mxu0 %v2972_v37  ;;  %1797 = vmatpush1.bf16.msra.mxu0 %v2890_v1  ;;  %v2893_v1 = vld [vmem:[#allocation6 + $0x78] sm:$0xff]  }
 0x219   :  { %v683_v52 = vadd.f32 %v3351_v36, %v682_v51  ;;  %v2735_v53 = vpop.f32.mrb[31].mxu1  ;;  %1798 = vmatprep.subr.bf16.mxu0 %v2972_v37  ;;  %v788_v54 = vmax.f32 %v680_v49, 0.0  ;;  %2811 = vmatpush1.bf16.msra.mxu1 %v2893_v1 }
 0x21b   :  { %v789_v55 = vmax.f32 %v683_v52, 0.0 }
 0x21c   :  { %1799 = vmatpush1.bf16.msra.mxu0 %v2891_v41 }
 0x21d   :  { %v819_v56 = vpack.c.bf16 %v789_v55, %v788_v54  ;;  %1800 = vmatprep.subr.bf16.mxu0 %v2972_v37 }
 0x21e   :  { %v687_v57 = vpop.f32.mrb[32].mxu1 }
 0x21f   :  { %v688_v58 = vadd.f32 %v3351_v36, %v687_v57  ;;  %v2738_v59 = vpop.f32.mrb[33].mxu1  ;;  %1042 = vmatmul.mubr.bf16.gmra.mrb[104].mxu0 %v819_v56 }
 0x220   :  { %v690_v60 = vpop.f32.mrb[34].mxu1  ;;  %1051 = vmatprep.mubr.bf16.mxu0 %v2972_v37  ;;  %1801 = vmatpush1.bf16.msra.mxu0 %v2892_v29 }
 0x221   :  { %v691_v61 = vadd.f32 %v3351_v36, %v690_v60  ;;  %v2739_v62 = vpop.f32.mrb[35].mxu1  ;;  %v790_v63 = vmax.f32 %v688_v58, 0.0  ;;  %1802 = vmatprep.subr.bf16.mxu0 %v2972_v37 }
 0x223   :  { %v791_v0 = vmax.f32 %v691_v61, 0.0 }
 0x224   :  { %1803 = vmatpush1.bf16.msra.mxu0 %v2893_v1 }
 0x225   :  { %v820_v2 = vpack.c.bf16 %v791_v0, %v790_v63 }
 0x226   :  { %v695_v3 = vpop.f32.mrb[36].mxu1 }
 0x227   :  { %v696_v4 = vadd.f32 %v3351_v36, %v695_v3  ;;  %v2742_v5 = vpop.f32.mrb[37].mxu1  ;;  %1052 = vmatmul.mubr.bf16.gmra.mrb[108].mxu0 %v820_v2 }
 0x228   :  { %v698_v6 = vpop.f32.mrb[38].mxu1  ;;  %1061 = vmatprep.mubr.bf16.mxu0 %v2972_v37 }
 0x229   :  { %v699_v7 = vadd.f32 %v3351_v36, %v698_v6  ;;  %v2743_v8 = vpop.f32.mrb[39].mxu1  ;;  %v792_v9 = vmax.f32 %v696_v4, 0.0 }
 0x22b   :  { %v793_v10 = vmax.f32 %v699_v7, 0.0 }
 0x22d   :  { %v821_v11 = vpack.c.bf16 %v793_v10, %v792_v9 }
 0x22e   :  { %v703_v12 = vpop.f32.mrb[40].mxu1 }
 0x22f   :  { %v704_v13 = vadd.f32 %v3351_v36, %v703_v12  ;;  %v2746_v14 = vpop.f32.mrb[41].mxu1  ;;  %1062 = vmatmul.mubr.bf16.gmra.mrb[112].mxu0 %v821_v11 }
 0x230   :  { %v706_v15 = vpop.f32.mrb[42].mxu1  ;;  %1071 = vmatprep.mubr.bf16.mxu0 %v2972_v37 }
 0x231   :  { %v707_v16 = vadd.f32 %v3351_v36, %v706_v15  ;;  %v2747_v17 = vpop.f32.mrb[43].mxu1  ;;  %v794_v18 = vmax.f32 %v704_v13, 0.0 }
 0x233   :  { %v795_v19 = vmax.f32 %v707_v16, 0.0 }
 0x235   :  { %v822_v20 = vpack.c.bf16 %v795_v19, %v794_v18 }
 0x236   :  { %v711_v21 = vpop.f32.mrb[44].mxu1 }
 0x237   :  { %v712_v22 = vadd.f32 %v3351_v36, %v711_v21  ;;  %v2750_v23 = vpop.f32.mrb[45].mxu1  ;;  %1072 = vmatmul.mubr.bf16.gmra.mrb[116].mxu0 %v822_v20 }
 0x238   :  { %v714_v24 = vpop.f32.mrb[46].mxu1  ;;  %1081 = vmatprep.mubr.bf16.mxu0 %v2972_v37 }
 0x239   :  { %v715_v25 = vadd.f32 %v3351_v36, %v714_v24  ;;  %v2751_v26 = vpop.f32.mrb[47].mxu1  ;;  %v796_v27 = vmax.f32 %v712_v22, 0.0 }
 0x23b   :  { %v797_v28 = vmax.f32 %v715_v25, 0.0 }
 0x23d   :  { %v823_v30 = vpack.c.bf16 %v797_v28, %v796_v27 }
 0x23e   :  { %v719_v31 = vpop.f32.mrb[48].mxu1 }
 0x23f   :  { %v720_v32 = vadd.f32 %v3351_v36, %v719_v31  ;;  %v2754_v33 = vpop.f32.mrb[49].mxu1  ;;  %1082 = vmatmul.mubr.bf16.gmra.mrb[120].mxu0 %v823_v30 }
 0x240   :  { %v722_v34 = vpop.f32.mrb[50].mxu1  ;;  %1091 = vmatprep.mubr.bf16.mxu0 %v2972_v37  ;;  %v849_v33 = vlaneseq }
 0x241   :  { %v723_v35 = vadd.f32 %v3351_v36, %v722_v34  ;;  %v2755_v38 = vpop.f32.mrb[51].mxu1  ;;  %v798_v39 = vmax.f32 %v720_v32, 0.0 }
 0x242   :  { %v3435_v34 = vshrl.u32 %v849_v33, 7 }
 0x243   :  { %v799_v40 = vmax.f32 %v723_v35, 0.0  ;;  %v847_v35 = vld [vmem:[%s4143_s6] sm:$0x3] }
 0x244   :  { %v851_v1 = vsub.s32 0, %v3435_v34  ;;  %v855_v38 = vsub.s32 1, %v3435_v34 }
 0x245   :  { %v824_v41 = vpack.c.bf16 %v799_v40, %v798_v39 }
 0x246   :  { %v727_v42 = vpop.f32.mrb[52].mxu1  ;;  %v3442_v39 = vrot.slane %v847_v35, %v851_v1 }
 0x247   :  { %v728_v43 = vadd.f32 %v3351_v36, %v727_v42  ;;  %v2758_v44 = vpop.f32.mrb[53].mxu1  ;;  %1092 = vmatmul.mubr.bf16.gmra.mrb[124].mxu0 %v824_v41 }
 0x248   :  { %v730_v45 = vpop.f32.mrb[54].mxu1  ;;  %1101 = vmatprep.mubr.bf16.mxu0 %v2972_v37 }
 0x249   :  { %v731_v46 = vadd.f32 %v3351_v36, %v730_v45  ;;  %v2759_v47 = vpop.f32.mrb[55].mxu1  ;;  %v800_v48 = vmax.f32 %v728_v43, 0.0 }
 0x24a   :  { %v1352_v47 = vld [vmem:[%s4144_s7] sm:$0x3] }
 0x24b   :  { %v801_v49 = vmax.f32 %v731_v46, 0.0 }
 0x24d   :  { %v825_v50 = vpack.c.bf16 %v801_v49, %v800_v48 }
 0x24e   :  { %v735_v51 = vpop.f32.mrb[56].mxu1 }
 0x24f   :  { %v736_v52 = vadd.f32 %v3351_v36, %v735_v51  ;;  %v2762_v53 = vpop.f32.mrb[57].mxu1  ;;  %1102 = vmatmul.mubr.bf16.gmra.mrb[128].mxu0 %v825_v50 }
 0x250   :  { %v738_v54 = vpop.f32.mrb[58].mxu1  ;;  %1111 = vmatprep.mubr.bf16.mxu0 %v2972_v37  ;;  %v3453_v53 = vrot.slane %v1352_v47, %v851_v1 }
 0x251   :  { %v739_v55 = vadd.f32 %v3351_v36, %v738_v54  ;;  %v2763_v56 = vpop.f32.mrb[59].mxu1  ;;  %v802_v57 = vmax.f32 %v736_v52, 0.0 }
 0x252   :  { %v3455_v56 = vrot.slane %v1352_v47, %v855_v38 }
 0x253   :  { %v803_v58 = vmax.f32 %v739_v55, 0.0 }
 0x255   :  { %v826_v59 = vpack.c.bf16 %v803_v58, %v802_v57 }
 0x256   :  { %v743_v60 = vpop.f32.mrb[60].mxu1 }
 0x257   :  { %v744_v61 = vadd.f32 %v3351_v36, %v743_v60  ;;  %v2766_v62 = vpop.f32.mrb[61].mxu1  ;;  %1112 = vmatmul.mubr.bf16.gmra.mrb[132].mxu0 %v826_v59 }
 0x258   :  { %v746_v63 = vpop.f32.mrb[62].mxu1  ;;  %1121 = vmatprep.mubr.bf16.mxu0 %v2972_v37 }
 0x259   :  { %v747_v0 = vadd.f32 %v3351_v36, %v746_v63  ;;  %v2767_v2 = vpop.f32.mrb[63].mxu1  ;;  %v804_v3 = vmax.f32 %v744_v61, 0.0 }
 0x25b   :  { %v805_v4 = vmax.f32 %v747_v0, 0.0 }
 0x25d   :  { %v827_v5 = vpack.c.bf16 %v805_v4, %v804_v3 }
 0x25e   :  { %v751_v6 = vpop.f32.mrb[64].mxu1 }
 0x25f   :  { %v752_v7 = vadd.f32 %v3351_v36, %v751_v6  ;;  %v2770_v8 = vpop.f32.mrb[65].mxu1  ;;  %1122 = vmatmul.mubr.bf16.gmra.mrb[136].mxu0 %v827_v5 }
 0x260   :  { %v754_v9 = vpop.f32.mrb[66].mxu1  ;;  %1131 = vmatprep.mubr.bf16.mxu0 %v2972_v37 }
 0x261   :  { %v755_v10 = vadd.f32 %v3351_v36, %v754_v9  ;;  %v2771_v11 = vpop.f32.mrb[67].mxu1  ;;  %v806_v12 = vmax.f32 %v752_v7, 0.0 }
 0x263   :  { %v807_v13 = vmax.f32 %v755_v10, 0.0 }
 0x265   :  { %v828_v14 = vpack.c.bf16 %v807_v13, %v806_v12 }
 0x266   :  { %v759_v15 = vpop.f32.mrb[68].mxu1 }
 0x267   :  { %v760_v16 = vadd.f32 %v3351_v36, %v759_v15  ;;  %v2774_v17 = vpop.f32.mrb[69].mxu1  ;;  %1132 = vmatmul.mubr.bf16.gmra.mrb[140].mxu0 %v828_v14 }
 0x268   :  { %v762_v18 = vpop.f32.mrb[70].mxu1  ;;  %1141 = vmatprep.mubr.bf16.mxu0 %v2972_v37 }
 0x269   :  { %v763_v19 = vadd.f32 %v3351_v36, %v762_v18  ;;  %v2775_v20 = vpop.f32.mrb[71].mxu1  ;;  %v808_v21 = vmax.f32 %v760_v16, 0.0 }
 0x26b   :  { %v809_v22 = vmax.f32 %v763_v19, 0.0 }
 0x26d   :  { %v829_v23 = vpack.c.bf16 %v809_v22, %v808_v21 }
 0x26e   :  { %v767_v24 = vpop.f32.mrb[72].mxu1 }
 0x26f   :  { %v768_v25 = vadd.f32 %v3351_v36, %v767_v24  ;;  %v2778_v26 = vpop.f32.mrb[73].mxu1  ;;  %1142 = vmatmul.mubr.bf16.gmra.mrb[144].mxu0 %v829_v23 }
 0x270   :  { %v770_v27 = vpop.f32.mrb[74].mxu1  ;;  %1151 = vmatprep.mubr.bf16.mxu0 %v2972_v37  ;;  %v3444_v37 = vrot.slane %v847_v35, %v855_v38 }
 0x271   :  { %v771_v28 = vadd.f32 %v3351_v36, %v770_v27  ;;  %v2779_v29 = vpop.f32.mrb[75].mxu1  ;;  %v810_v30 = vmax.f32 %v768_v25, 0.0 }
 0x273   :  { %v811_v31 = vmax.f32 %v771_v28, 0.0 }
 0x275   :  { %v830_v32 = vpack.c.bf16 %v811_v31, %v810_v30 }
 0x277   :  { %1152 = vmatmul.mubr.bf16.gmra.mrb[148].mxu0 %v830_v32 }
 0x2ba   :  { %v973_v36 = vpop.f32.mrb[76].mxu0 }
 0x2bb   :  { %v974_v40 = vadd.f32 %v973_v36, %v3442_v39  ;;  %v975_v41 = vpop.f32.mrb[77].mxu0 }
 0x2bc   :  { %v976_v42 = vadd.f32 %v975_v41, %v3444_v37  ;;  %v977_v43 = vpop.f32.mrb[78].mxu0 }
 0x2bd   :  { %v978_v44 = vadd.f32 %v977_v43, %v3442_v39  ;;  %v979_v45 = vpop.f32.mrb[79].mxu0  ;;  %v1162_v48 = vmax.f32 %v974_v40, 0.0 }
 0x2be   :  { %v980_v46 = vadd.f32 %v979_v45, %v3444_v37  ;;  %v1163_v50 = vmax.f32 %v976_v42, 0.0 }
 0x2bf   :  { %v1164_v49 = vmax.f32 %v978_v44, 0.0 }
 0x2c0   :  { %v1165_v51 = vmax.f32 %v980_v46, 0.0 }
 0x2c1   :  { %v1238_v52 = vpack.c.bf16 %v1164_v49, %v1162_v48 }
 0x2c2   :  { %v1239_v54 = vpack.c.bf16 %v1165_v51, %v1163_v50  ;;  %v983_v55 = vpop.f32.mrb[80].mxu0 }
 0x2c3   :  { %v984_v57 = vadd.f32 %v983_v55, %v3442_v39  ;;  %v985_v58 = vpop.f32.mrb[81].mxu0  ;;  %v1276_v59 = vunpack.c.l.bf16 %v1238_v52  ;;  %v1278_v60 = vunpack.c.h.bf16 %v1238_v52 }
 0x2c4   :  { %v986_v61 = vadd.f32 %v985_v58, %v3444_v37  ;;  %v987_v62 = vpop.f32.mrb[82].mxu0  ;;  %1804 = vmatprep.mubr.bf16.mxu0 %v1239_v54  ;;  %v1277_v63 = vunpack.c.l.bf16 %v1239_v54  ;;  %v1279_v0 = vunpack.c.h.bf16 %v1239_v54 }
 0x2c5   :  { %v988_v2 = vadd.f32 %v987_v62, %v3442_v39  ;;  %v989_v3 = vpop.f32.mrb[83].mxu0  ;;  %1805 = vmatmul.mubr.bf16.vlgmr.msra.gmra.mrb[152].mxu0 %v1238_v52  ;;  %v1364_v4 = vmul.f32 %v3453_v53, %v1276_v59  ;;  %v1366_v5 = vmul.f32 %v3453_v53, %v1278_v60  ;;  %v1166_v9 = vmax.f32 %v984_v57, 0.0 }
 0x2c6   :  { %v990_v6 = vadd.f32 %v989_v3, %v3444_v37  ;;  %v1365_v7 = vmul.f32 %v3455_v56, %v1277_v63  ;;  %v1367_v8 = vmul.f32 %v3455_v56, %v1279_v0  ;;  %v1167_v11 = vmax.f32 %v986_v61, 0.0 }
 0x2c7   :  { %v1168_v10 = vmax.f32 %v988_v2, 0.0 }
 0x2c8   :  { %v1169_v12 = vmax.f32 %v990_v6, 0.0  ;;  %v1440_v13 = vadd.f32 %v1365_v7, %v1364_v4  ;;  %v1443_v14 = vadd.f32 %v1367_v8, %v1366_v5 }
 0x2c9   :  { %v1240_v15 = vpack.c.bf16 %v1168_v10, %v1166_v9 }
 0x2ca   :  { %v1241_v16 = vpack.c.bf16 %v1169_v12, %v1167_v11  ;;  %v993_v17 = vpop.f32.mrb[84].mxu0  ;;  %1441 = vadd.xlane.f32.xlu0 %v1440_v13 }
 0x2cb   :  { %v994_v18 = vadd.f32 %v993_v17, %v3442_v39  ;;  %v995_v19 = vpop.f32.mrb[85].mxu0  ;;  %v1280_v20 = vunpack.c.l.bf16 %v1240_v15  ;;  %v1282_v21 = vunpack.c.h.bf16 %v1240_v15 }
 0x2cc   :  { %v996_v22 = vadd.f32 %v995_v19, %v3444_v37  ;;  %v997_v23 = vpop.f32.mrb[86].mxu0  ;;  %1812 = vmatprep.mubr.bf16.mxu1 %v1241_v16  ;;  %v1281_v24 = vunpack.c.l.bf16 %v1241_v16  ;;  %v1283_v25 = vunpack.c.h.bf16 %v1241_v16 }
 0x2cd   :  { %v998_v26 = vadd.f32 %v997_v23, %v3442_v39  ;;  %v999_v27 = vpop.f32.mrb[87].mxu0  ;;  %1813 = vmatmul.mubr.bf16.vlgmr.msra.gmra.mrb[76].mxu1 %v1240_v15  ;;  %v1368_v28 = vmul.f32 %v3453_v53, %v1280_v20  ;;  %v1370_v29 = vmul.f32 %v3453_v53, %v1282_v21  ;;  %v1170_v33 = vmax.f32 %v994_v18, 0.0 }
 0x2ce   :  { %v1000_v30 = vadd.f32 %v999_v27, %v3444_v37  ;;  %1444 = vadd.xlane.f32.xlu0 %v1443_v14  ;;  %v1369_v31 = vmul.f32 %v3455_v56, %v1281_v24  ;;  %v1371_v32 = vmul.f32 %v3455_v56, %v1283_v25  ;;  %v1171_v35 = vmax.f32 %v996_v22, 0.0 }
 0x2cf   :  { %v1172_v1 = vmax.f32 %v998_v26, 0.0 }
 0x2d0   :  { %v1173_v38 = vmax.f32 %v1000_v30, 0.0  ;;  %v1446_v36 = vadd.f32 %v1369_v31, %v1368_v28  ;;  %v1449_v40 = vadd.f32 %v1371_v32, %v1370_v29 }
 0x2d1   :  { %v1242_v41 = vpack.c.bf16 %v1172_v1, %v1170_v33 }
 0x2d2   :  { %v1243_v42 = vpack.c.bf16 %v1173_v38, %v1171_v35  ;;  %v1003_v43 = vpop.f32.mrb[88].mxu0  ;;  %1447 = vadd.xlane.f32.xlu1 %v1446_v36 }
 0x2d3   :  { %v1004_v44 = vadd.f32 %v1003_v43, %v3442_v39  ;;  %v1005_v45 = vpop.f32.mrb[89].mxu0  ;;  %v1286_v46 = vunpack.c.h.bf16 %v1242_v41  ;;  %v1284_v47 = vunpack.c.l.bf16 %v1242_v41 }
 0x2d4   :  { %v1006_v48 = vadd.f32 %v1005_v45, %v3444_v37  ;;  %v1007_v49 = vpop.f32.mrb[90].mxu0  ;;  %1820 = vmatprep.mubr.bf16.mxu1 %v1243_v42  ;;  %v1287_v50 = vunpack.c.h.bf16 %v1243_v42  ;;  %v1285_v51 = vunpack.c.l.bf16 %v1243_v42 }
 0x2d5   :  { %v1008_v52 = vadd.f32 %v1007_v49, %v3442_v39  ;;  %v1009_v54 = vpop.f32.mrb[91].mxu0  ;;  %1821 = vmatmul.mubr.bf16.gmra.mrb[80].mxu1 %v1242_v41  ;;  %v1374_v55 = vmul.f32 %v3453_v53, %v1286_v46  ;;  %v1372_v57 = vmul.f32 %v3453_v53, %v1284_v47  ;;  %v1174_v61 = vmax.f32 %v1004_v44, 0.0 }
 0x2d6   :  { %v1010_v58 = vadd.f32 %v1009_v54, %v3444_v37  ;;  %1450 = vadd.xlane.f32.xlu1 %v1449_v40  ;;  %v1375_v59 = vmul.f32 %v3455_v56, %v1287_v50  ;;  %v1373_v60 = vmul.f32 %v3455_v56, %v1285_v51  ;;  %v1175_v63 = vmax.f32 %v1006_v48, 0.0 }
 0x2d7   :  { %v1176_v62 = vmax.f32 %v1008_v52, 0.0 }
 0x2d8   :  { %v1177_v0 = vmax.f32 %v1010_v58, 0.0  ;;  %v1455_v2 = vadd.f32 %v1375_v59, %v1374_v55  ;;  %v1452_v3 = vadd.f32 %v1373_v60, %v1372_v57 }
 0x2d9   :  { %v1244_v4 = vpack.c.bf16 %v1176_v62, %v1174_v61 }
 0x2da   :  { %v1245_v5 = vpack.c.bf16 %v1177_v0, %v1175_v63  ;;  %v1013_v6 = vpop.f32.mrb[92].mxu0  ;;  %1456 = vadd.xlane.f32.xlu1 %v1455_v2  ;;  %1453 = vadd.xlane.f32.xlu0 %v1452_v3 }
 0x2db   :  { %v1014_v7 = vadd.f32 %v1013_v6, %v3442_v39  ;;  %v1015_v8 = vpop.f32.mrb[93].mxu0  ;;  %v1290_v9 = vunpack.c.h.bf16 %v1244_v4  ;;  %v1288_v10 = vunpack.c.l.bf16 %v1244_v4 }
 0x2dc   :  { %v1016_v11 = vadd.f32 %v1015_v8, %v3444_v37  ;;  %v1017_v12 = vpop.f32.mrb[94].mxu0  ;;  %1828 = vmatprep.mubr.bf16.mxu1 %v1245_v5  ;;  %v1291_v13 = vunpack.c.h.bf16 %v1245_v5  ;;  %v1289_v14 = vunpack.c.l.bf16 %v1245_v5 }
 0x2dd   :  { %v1018_v15 = vadd.f32 %v1017_v12, %v3442_v39  ;;  %v1019_v16 = vpop.f32.mrb[95].mxu0  ;;  %1829 = vmatmul.mubr.bf16.gmra.mrb[84].mxu1 %v1244_v4  ;;  %v1378_v17 = vmul.f32 %v3453_v53, %v1290_v9  ;;  %v1376_v18 = vmul.f32 %v3453_v53, %v1288_v10  ;;  %v1178_v22 = vmax.f32 %v1014_v7, 0.0 }
 0x2de   :  { %v1020_v19 = vadd.f32 %v1019_v16, %v3444_v37  ;;  %v1379_v20 = vmul.f32 %v3455_v56, %v1291_v13  ;;  %v1377_v21 = vmul.f32 %v3455_v56, %v1289_v14  ;;  %v1179_v24 = vmax.f32 %v1016_v11, 0.0 }
 0x2df   :  { %v1180_v23 = vmax.f32 %v1018_v15, 0.0 }
 0x2e0   :  { %v1181_v25 = vmax.f32 %v1020_v19, 0.0  ;;  %v1461_v26 = vadd.f32 %v1379_v20, %v1378_v17  ;;  %v1458_v27 = vadd.f32 %v1377_v21, %v1376_v18 }
 0x2e1   :  { %v1246_v28 = vpack.c.bf16 %v1180_v23, %v1178_v22 }
 0x2e2   :  { %v1247_v29 = vpack.c.bf16 %v1181_v25, %v1179_v24  ;;  %v1023_v30 = vpop.f32.mrb[96].mxu0  ;;  %1462 = vadd.xlane.f32.xlu1 %v1461_v26  ;;  %1459 = vadd.xlane.f32.xlu0 %v1458_v27 }
 0x2e3   :  { %v1024_v31 = vadd.f32 %v1023_v30, %v3442_v39  ;;  %v1025_v32 = vpop.f32.mrb[97].mxu0  ;;  %v1294_v33 = vunpack.c.h.bf16 %v1246_v28  ;;  %v1292_v1 = vunpack.c.l.bf16 %v1246_v28 }
 0x2e4   :  { %v1026_v35 = vadd.f32 %v1025_v32, %v3444_v37  ;;  %v1027_v38 = vpop.f32.mrb[98].mxu0  ;;  %1836 = vmatprep.mubr.bf16.mxu1 %v1247_v29  ;;  %v1295_v36 = vunpack.c.h.bf16 %v1247_v29  ;;  %v1293_v40 = vunpack.c.l.bf16 %v1247_v29 }
 0x2e5   :  { %v1028_v41 = vadd.f32 %v1027_v38, %v3442_v39  ;;  %v1029_v42 = vpop.f32.mrb[99].mxu0  ;;  %1837 = vmatmul.mubr.bf16.gmra.mrb[88].mxu1 %v1246_v28  ;;  %v1382_v43 = vmul.f32 %v3453_v53, %v1294_v33  ;;  %v1380_v44 = vmul.f32 %v3453_v53, %v1292_v1  ;;  %v1182_v48 = vmax.f32 %v1024_v31, 0.0 }
 0x2e6   :  { %v1030_v45 = vadd.f32 %v1029_v42, %v3444_v37  ;;  %v1383_v46 = vmul.f32 %v3455_v56, %v1295_v36  ;;  %v1381_v47 = vmul.f32 %v3455_v56, %v1293_v40  ;;  %v1183_v50 = vmax.f32 %v1026_v35, 0.0 }
 0x2e7   :  { %v1184_v49 = vmax.f32 %v1028_v41, 0.0 }
 0x2e8   :  { %v1185_v51 = vmax.f32 %v1030_v45, 0.0  ;;  %v1467_v52 = vadd.f32 %v1383_v46, %v1382_v43  ;;  %v1464_v54 = vadd.f32 %v1381_v47, %v1380_v44 }
 0x2e9   :  { %v1248_v55 = vpack.c.bf16 %v1184_v49, %v1182_v48 }
 0x2ea   :  { %v1249_v57 = vpack.c.bf16 %v1185_v51, %v1183_v50  ;;  %v1033_v58 = vpop.f32.mrb[100].mxu0  ;;  %1468 = vadd.xlane.f32.xlu1 %v1467_v52  ;;  %1465 = vadd.xlane.f32.xlu0 %v1464_v54 }
 0x2eb   :  { %v1034_v59 = vadd.f32 %v1033_v58, %v3442_v39  ;;  %v1035_v60 = vpop.f32.mrb[101].mxu0  ;;  %v1298_v61 = vunpack.c.h.bf16 %v1248_v55  ;;  %v1296_v62 = vunpack.c.l.bf16 %v1248_v55 }
 0x2ec   :  { %v1036_v63 = vadd.f32 %v1035_v60, %v3444_v37  ;;  %v1037_v0 = vpop.f32.mrb[102].mxu0  ;;  %1844 = vmatprep.mubr.bf16.mxu1 %v1249_v57  ;;  %v1299_v2 = vunpack.c.h.bf16 %v1249_v57  ;;  %v1297_v3 = vunpack.c.l.bf16 %v1249_v57 }
 0x2ed   :  { %v1038_v4 = vadd.f32 %v1037_v0, %v3442_v39  ;;  %v1039_v5 = vpop.f32.mrb[103].mxu0  ;;  %1845 = vmatmul.mubr.bf16.gmra.mrb[92].mxu1 %v1248_v55  ;;  %v1386_v6 = vmul.f32 %v3453_v53, %v1298_v61  ;;  %v1384_v7 = vmul.f32 %v3453_v53, %v1296_v62  ;;  %v1186_v11 = vmax.f32 %v1034_v59, 0.0 }
 0x2ee   :  { %v1040_v8 = vadd.f32 %v1039_v5, %v3444_v37  ;;  %v1387_v9 = vmul.f32 %v3455_v56, %v1299_v2  ;;  %v1385_v10 = vmul.f32 %v3455_v56, %v1297_v3  ;;  %v1187_v13 = vmax.f32 %v1036_v63, 0.0 }
 0x2ef   :  { %v1188_v12 = vmax.f32 %v1038_v4, 0.0 }
 0x2f0   :  { %v1189_v14 = vmax.f32 %v1040_v8, 0.0  ;;  %v1473_v15 = vadd.f32 %v1387_v9, %v1386_v6  ;;  %v1470_v16 = vadd.f32 %v1385_v10, %v1384_v7 }
 0x2f1   :  { %v1250_v17 = vpack.c.bf16 %v1188_v12, %v1186_v11 }
 0x2f2   :  { %v1251_v18 = vpack.c.bf16 %v1189_v14, %v1187_v13  ;;  %v1043_v19 = vpop.f32.mrb[104].mxu0  ;;  %1474 = vadd.xlane.f32.xlu1 %v1473_v15  ;;  %1471 = vadd.xlane.f32.xlu0 %v1470_v16 }
 0x2f3   :  { %v1044_v20 = vadd.f32 %v1043_v19, %v3442_v39  ;;  %v1045_v21 = vpop.f32.mrb[105].mxu0  ;;  %v1302_v22 = vunpack.c.h.bf16 %v1250_v17  ;;  %v1300_v23 = vunpack.c.l.bf16 %v1250_v17 }
 0x2f4   :  { %v1046_v24 = vadd.f32 %v1045_v21, %v3444_v37  ;;  %v1047_v25 = vpop.f32.mrb[106].mxu0  ;;  %1852 = vmatprep.mubr.bf16.mxu1 %v1251_v18  ;;  %v1303_v26 = vunpack.c.h.bf16 %v1251_v18  ;;  %v1301_v27 = vunpack.c.l.bf16 %v1251_v18 }
 0x2f5   :  { %v1048_v28 = vadd.f32 %v1047_v25, %v3442_v39  ;;  %v1049_v29 = vpop.f32.mrb[107].mxu0  ;;  %1853 = vmatmul.mubr.bf16.gmra.mrb[96].mxu1 %v1250_v17  ;;  %v1390_v30 = vmul.f32 %v3453_v53, %v1302_v22  ;;  %v1388_v31 = vmul.f32 %v3453_v53, %v1300_v23  ;;  %v1190_v35 = vmax.f32 %v1044_v20, 0.0 }
 0x2f6   :  { %v1050_v32 = vadd.f32 %v1049_v29, %v3444_v37  ;;  %v1391_v33 = vmul.f32 %v3455_v56, %v1303_v26  ;;  %v1389_v1 = vmul.f32 %v3455_v56, %v1301_v27  ;;  %v1191_v36 = vmax.f32 %v1046_v24, 0.0 }
 0x2f7   :  { %v1192_v38 = vmax.f32 %v1048_v28, 0.0 }
 0x2f8   :  { %v1193_v40 = vmax.f32 %v1050_v32, 0.0  ;;  %v1479_v41 = vadd.f32 %v1391_v33, %v1390_v30  ;;  %v1476_v42 = vadd.f32 %v1389_v1, %v1388_v31 }
 0x2f9   :  { %v1252_v43 = vpack.c.bf16 %v1192_v38, %v1190_v35 }
 0x2fa   :  { %v1253_v44 = vpack.c.bf16 %v1193_v40, %v1191_v36  ;;  %v1053_v45 = vpop.f32.mrb[108].mxu0  ;;  %1480 = vadd.xlane.f32.xlu1 %v1479_v41  ;;  %1477 = vadd.xlane.f32.xlu0 %v1476_v42 }
 0x2fb   :  { %v1054_v46 = vadd.f32 %v1053_v45, %v3442_v39  ;;  %v1055_v47 = vpop.f32.mrb[109].mxu0  ;;  %v1306_v48 = vunpack.c.h.bf16 %v1252_v43  ;;  %v1304_v49 = vunpack.c.l.bf16 %v1252_v43 }
 0x2fc   :  { %v1056_v50 = vadd.f32 %v1055_v47, %v3444_v37  ;;  %v1057_v51 = vpop.f32.mrb[110].mxu0  ;;  %1860 = vmatprep.mubr.bf16.mxu1 %v1253_v44  ;;  %v1307_v52 = vunpack.c.h.bf16 %v1253_v44  ;;  %v1305_v54 = vunpack.c.l.bf16 %v1253_v44 }
 0x2fd   :  { %v1058_v55 = vadd.f32 %v1057_v51, %v3442_v39  ;;  %v1059_v57 = vpop.f32.mrb[111].mxu0  ;;  %1861 = vmatmul.mubr.bf16.gmra.mrb[100].mxu1 %v1252_v43  ;;  %v1394_v58 = vmul.f32 %v3453_v53, %v1306_v48  ;;  %v1392_v59 = vmul.f32 %v3453_v53, %v1304_v49  ;;  %v1194_v63 = vmax.f32 %v1054_v46, 0.0 }
 0x2fe   :  { %v1060_v60 = vadd.f32 %v1059_v57, %v3444_v37  ;;  %v1395_v61 = vmul.f32 %v3455_v56, %v1307_v52  ;;  %v1393_v62 = vmul.f32 %v3455_v56, %v1305_v54  ;;  %v1195_v2 = vmax.f32 %v1056_v50, 0.0 }
 0x2ff   :  { %v1196_v0 = vmax.f32 %v1058_v55, 0.0 }
 0x300   :  { %v1197_v3 = vmax.f32 %v1060_v60, 0.0  ;;  %v1485_v4 = vadd.f32 %v1395_v61, %v1394_v58  ;;  %v1482_v5 = vadd.f32 %v1393_v62, %v1392_v59 }
 0x301   :  { %v1254_v6 = vpack.c.bf16 %v1196_v0, %v1194_v63 }
 0x302   :  { %v1255_v7 = vpack.c.bf16 %v1197_v3, %v1195_v2  ;;  %v1063_v8 = vpop.f32.mrb[112].mxu0  ;;  %1486 = vadd.xlane.f32.xlu1 %v1485_v4  ;;  %1483 = vadd.xlane.f32.xlu0 %v1482_v5 }
 0x303   :  { %v1064_v9 = vadd.f32 %v1063_v8, %v3442_v39  ;;  %v1065_v10 = vpop.f32.mrb[113].mxu0  ;;  %v1310_v11 = vunpack.c.h.bf16 %v1254_v6  ;;  %v1308_v12 = vunpack.c.l.bf16 %v1254_v6 }
 0x304   :  { %v1066_v13 = vadd.f32 %v1065_v10, %v3444_v37  ;;  %v1067_v14 = vpop.f32.mrb[114].mxu0  ;;  %1868 = vmatprep.mubr.bf16.mxu1 %v1255_v7  ;;  %v1311_v15 = vunpack.c.h.bf16 %v1255_v7  ;;  %v1309_v16 = vunpack.c.l.bf16 %v1255_v7 }
 0x305   :  { %v1068_v17 = vadd.f32 %v1067_v14, %v3442_v39  ;;  %v1069_v18 = vpop.f32.mrb[115].mxu0  ;;  %1869 = vmatmul.mubr.bf16.gmra.mrb[104].mxu1 %v1254_v6  ;;  %v1398_v19 = vmul.f32 %v3453_v53, %v1310_v11  ;;  %v1396_v20 = vmul.f32 %v3453_v53, %v1308_v12  ;;  %v1198_v24 = vmax.f32 %v1064_v9, 0.0 }
 0x306   :  { %v1070_v21 = vadd.f32 %v1069_v18, %v3444_v37  ;;  %v1399_v22 = vmul.f32 %v3455_v56, %v1311_v15  ;;  %v1397_v23 = vmul.f32 %v3455_v56, %v1309_v16  ;;  %v1199_v26 = vmax.f32 %v1066_v13, 0.0 }
 0x307   :  { %v1200_v25 = vmax.f32 %v1068_v17, 0.0 }
 0x308   :  { %v1201_v27 = vmax.f32 %v1070_v21, 0.0  ;;  %v1491_v28 = vadd.f32 %v1399_v22, %v1398_v19  ;;  %v1488_v29 = vadd.f32 %v1397_v23, %v1396_v20 }
 0x309   :  { %v1256_v30 = vpack.c.bf16 %v1200_v25, %v1198_v24 }
 0x30a   :  { %v1257_v31 = vpack.c.bf16 %v1201_v27, %v1199_v26  ;;  %v1073_v32 = vpop.f32.mrb[116].mxu0  ;;  %1492 = vadd.xlane.f32.xlu1 %v1491_v28  ;;  %1489 = vadd.xlane.f32.xlu0 %v1488_v29 }
 0x30b   :  { %v1074_v33 = vadd.f32 %v1073_v32, %v3442_v39  ;;  %v1075_v1 = vpop.f32.mrb[117].mxu0  ;;  %v1314_v35 = vunpack.c.h.bf16 %v1256_v30  ;;  %v1312_v38 = vunpack.c.l.bf16 %v1256_v30 }
 0x30c   :  { %v1076_v36 = vadd.f32 %v1075_v1, %v3444_v37  ;;  %v1077_v40 = vpop.f32.mrb[118].mxu0  ;;  %1876 = vmatprep.mubr.bf16.mxu1 %v1257_v31  ;;  %v1315_v41 = vunpack.c.h.bf16 %v1257_v31  ;;  %v1313_v42 = vunpack.c.l.bf16 %v1257_v31 }
 0x30d   :  { %v1078_v43 = vadd.f32 %v1077_v40, %v3442_v39  ;;  %v1079_v44 = vpop.f32.mrb[119].mxu0  ;;  %1877 = vmatmul.mubr.bf16.gmra.mrb[108].mxu1 %v1256_v30  ;;  %v1402_v45 = vmul.f32 %v3453_v53, %v1314_v35  ;;  %v1400_v46 = vmul.f32 %v3453_v53, %v1312_v38  ;;  %v1202_v50 = vmax.f32 %v1074_v33, 0.0 }
 0x30e   :  { %v1080_v47 = vadd.f32 %v1079_v44, %v3444_v37  ;;  %v1403_v48 = vmul.f32 %v3455_v56, %v1315_v41  ;;  %v1401_v49 = vmul.f32 %v3455_v56, %v1313_v42  ;;  %v1203_v52 = vmax.f32 %v1076_v36, 0.0 }
 0x30f   :  { %v1204_v51 = vmax.f32 %v1078_v43, 0.0 }
 0x310   :  { %v1205_v54 = vmax.f32 %v1080_v47, 0.0  ;;  %v1497_v55 = vadd.f32 %v1403_v48, %v1402_v45  ;;  %v1494_v57 = vadd.f32 %v1401_v49, %v1400_v46 }
 0x311   :  { %v1258_v58 = vpack.c.bf16 %v1204_v51, %v1202_v50 }
 0x312   :  { %v1259_v59 = vpack.c.bf16 %v1205_v54, %v1203_v52  ;;  %v1083_v60 = vpop.f32.mrb[120].mxu0  ;;  %1498 = vadd.xlane.f32.xlu1 %v1497_v55  ;;  %1495 = vadd.xlane.f32.xlu0 %v1494_v57 }
 0x313   :  { %v1084_v61 = vadd.f32 %v1083_v60, %v3442_v39  ;;  %v1085_v62 = vpop.f32.mrb[121].mxu0  ;;  %v1318_v63 = vunpack.c.h.bf16 %v1258_v58  ;;  %v1316_v0 = vunpack.c.l.bf16 %v1258_v58 }
 0x314   :  { %v1086_v2 = vadd.f32 %v1085_v62, %v3444_v37  ;;  %v1087_v3 = vpop.f32.mrb[122].mxu0  ;;  %1884 = vmatprep.mubr.bf16.mxu1 %v1259_v59  ;;  %v1319_v4 = vunpack.c.h.bf16 %v1259_v59  ;;  %v1317_v5 = vunpack.c.l.bf16 %v1259_v59 }
 0x315   :  { %v1088_v6 = vadd.f32 %v1087_v3, %v3442_v39  ;;  %v1089_v7 = vpop.f32.mrb[123].mxu0  ;;  %1885 = vmatmul.mubr.bf16.gmra.mrb[112].mxu1 %v1258_v58  ;;  %v1406_v8 = vmul.f32 %v3453_v53, %v1318_v63  ;;  %v1404_v9 = vmul.f32 %v3453_v53, %v1316_v0  ;;  %v1206_v13 = vmax.f32 %v1084_v61, 0.0 }
 0x316   :  { %v1090_v10 = vadd.f32 %v1089_v7, %v3444_v37  ;;  %v1407_v11 = vmul.f32 %v3455_v56, %v1319_v4  ;;  %v1405_v12 = vmul.f32 %v3455_v56, %v1317_v5  ;;  %v1207_v15 = vmax.f32 %v1086_v2, 0.0 }
 0x317   :  { %v1208_v14 = vmax.f32 %v1088_v6, 0.0 }
 0x318   :  { %v1209_v16 = vmax.f32 %v1090_v10, 0.0  ;;  %v1503_v17 = vadd.f32 %v1407_v11, %v1406_v8  ;;  %v1500_v18 = vadd.f32 %v1405_v12, %v1404_v9 }
 0x319   :  { %v1260_v19 = vpack.c.bf16 %v1208_v14, %v1206_v13 }
 0x31a   :  { %v1261_v20 = vpack.c.bf16 %v1209_v16, %v1207_v15  ;;  %v1093_v21 = vpop.f32.mrb[124].mxu0  ;;  %1504 = vadd.xlane.f32.xlu1 %v1503_v17  ;;  %1501 = vadd.xlane.f32.xlu0 %v1500_v18 }
 0x31b   :  { %v1094_v22 = vadd.f32 %v1093_v21, %v3442_v39  ;;  %v1095_v23 = vpop.f32.mrb[125].mxu0  ;;  %v1322_v24 = vunpack.c.h.bf16 %v1260_v19  ;;  %v1320_v25 = vunpack.c.l.bf16 %v1260_v19 }
 0x31c   :  { %v1096_v26 = vadd.f32 %v1095_v23, %v3444_v37  ;;  %v1097_v27 = vpop.f32.mrb[126].mxu0  ;;  %1892 = vmatprep.mubr.bf16.mxu1 %v1261_v20  ;;  %v1323_v28 = vunpack.c.h.bf16 %v1261_v20  ;;  %v1321_v29 = vunpack.c.l.bf16 %v1261_v20 }
 0x31d   :  { %v1098_v30 = vadd.f32 %v1097_v27, %v3442_v39  ;;  %v1099_v31 = vpop.f32.mrb[127].mxu0  ;;  %1893 = vmatmul.mubr.bf16.gmra.mrb[116].mxu1 %v1260_v19  ;;  %v1410_v32 = vmul.f32 %v3453_v53, %v1322_v24  ;;  %v1408_v33 = vmul.f32 %v3453_v53, %v1320_v25  ;;  %v1210_v36 = vmax.f32 %v1094_v22, 0.0 }
 0x31e   :  { %v1100_v1 = vadd.f32 %v1099_v31, %v3444_v37  ;;  %v1411_v35 = vmul.f32 %v3455_v56, %v1323_v28  ;;  %v1409_v38 = vmul.f32 %v3455_v56, %v1321_v29  ;;  %v1211_v41 = vmax.f32 %v1096_v26, 0.0 }
 0x31f   :  { %v1212_v40 = vmax.f32 %v1098_v30, 0.0 }
 0x320   :  { %v1213_v42 = vmax.f32 %v1100_v1, 0.0  ;;  %v1509_v43 = vadd.f32 %v1411_v35, %v1410_v32  ;;  %v1506_v44 = vadd.f32 %v1409_v38, %v1408_v33 }
 0x321   :  { %v1262_v45 = vpack.c.bf16 %v1212_v40, %v1210_v36 }
 0x322   :  { %v1263_v46 = vpack.c.bf16 %v1213_v42, %v1211_v41  ;;  %v1103_v47 = vpop.f32.mrb[128].mxu0  ;;  %1510 = vadd.xlane.f32.xlu1 %v1509_v43  ;;  %1507 = vadd.xlane.f32.xlu0 %v1506_v44 }
 0x323   :  { %v1104_v48 = vadd.f32 %v1103_v47, %v3442_v39  ;;  %v1105_v49 = vpop.f32.mrb[129].mxu0  ;;  %v1326_v50 = vunpack.c.h.bf16 %v1262_v45  ;;  %v1324_v51 = vunpack.c.l.bf16 %v1262_v45 }
 0x324   :  { %v1106_v52 = vadd.f32 %v1105_v49, %v3444_v37  ;;  %v1107_v54 = vpop.f32.mrb[130].mxu0  ;;  %1900 = vmatprep.mubr.bf16.mxu1 %v1263_v46  ;;  %v1327_v55 = vunpack.c.h.bf16 %v1263_v46  ;;  %v1325_v57 = vunpack.c.l.bf16 %v1263_v46 }
 0x325   :  { %v1108_v58 = vadd.f32 %v1107_v54, %v3442_v39  ;;  %v1109_v59 = vpop.f32.mrb[131].mxu0  ;;  %1901 = vmatmul.mubr.bf16.gmra.mrb[120].mxu1 %v1262_v45  ;;  %v1414_v60 = vmul.f32 %v3453_v53, %v1326_v50  ;;  %v1412_v61 = vmul.f32 %v3453_v53, %v1324_v51  ;;  %v1214_v2 = vmax.f32 %v1104_v48, 0.0 }
 0x326   :  { %v1110_v62 = vadd.f32 %v1109_v59, %v3444_v37  ;;  %v1415_v63 = vmul.f32 %v3455_v56, %v1327_v55  ;;  %v1413_v0 = vmul.f32 %v3455_v56, %v1325_v57  ;;  %v1215_v4 = vmax.f32 %v1106_v52, 0.0 }
 0x327   :  { %v1216_v3 = vmax.f32 %v1108_v58, 0.0 }
 0x328   :  { %v1217_v5 = vmax.f32 %v1110_v62, 0.0  ;;  %v1515_v6 = vadd.f32 %v1415_v63, %v1414_v60  ;;  %v1512_v7 = vadd.f32 %v1413_v0, %v1412_v61 }
 0x329   :  { %v1264_v8 = vpack.c.bf16 %v1216_v3, %v1214_v2 }
 0x32a   :  { %v1265_v9 = vpack.c.bf16 %v1217_v5, %v1215_v4  ;;  %v1113_v10 = vpop.f32.mrb[132].mxu0  ;;  %1516 = vadd.xlane.f32.xlu1 %v1515_v6  ;;  %1513 = vadd.xlane.f32.xlu0 %v1512_v7 }
 0x32b   :  { %v1114_v11 = vadd.f32 %v1113_v10, %v3442_v39  ;;  %v1115_v12 = vpop.f32.mrb[133].mxu0  ;;  %v1330_v13 = vunpack.c.h.bf16 %v1264_v8  ;;  %v1328_v14 = vunpack.c.l.bf16 %v1264_v8 }
 0x32c   :  { %v1116_v15 = vadd.f32 %v1115_v12, %v3444_v37  ;;  %v1117_v16 = vpop.f32.mrb[134].mxu0  ;;  %1908 = vmatprep.mubr.bf16.mxu1 %v1265_v9  ;;  %v1331_v17 = vunpack.c.h.bf16 %v1265_v9  ;;  %v1329_v18 = vunpack.c.l.bf16 %v1265_v9 }
 0x32d   :  { %v1118_v19 = vadd.f32 %v1117_v16, %v3442_v39  ;;  %v1119_v20 = vpop.f32.mrb[135].mxu0  ;;  %1909 = vmatmul.mubr.bf16.gmra.mrb[124].mxu1 %v1264_v8  ;;  %v1418_v21 = vmul.f32 %v3453_v53, %v1330_v13  ;;  %v1416_v22 = vmul.f32 %v3453_v53, %v1328_v14  ;;  %v1218_v26 = vmax.f32 %v1114_v11, 0.0 }
 0x32e   :  { %v1120_v23 = vadd.f32 %v1119_v20, %v3444_v37  ;;  %v1419_v24 = vmul.f32 %v3455_v56, %v1331_v17  ;;  %v1417_v25 = vmul.f32 %v3455_v56, %v1329_v18  ;;  %v1219_v28 = vmax.f32 %v1116_v15, 0.0 }
 0x32f   :  { %v1220_v27 = vmax.f32 %v1118_v19, 0.0 }
 0x330   :  { %v1221_v29 = vmax.f32 %v1120_v23, 0.0  ;;  %v1521_v30 = vadd.f32 %v1419_v24, %v1418_v21  ;;  %v1518_v31 = vadd.f32 %v1417_v25, %v1416_v22 }
 0x331   :  { %v1266_v32 = vpack.c.bf16 %v1220_v27, %v1218_v26 }
 0x332   :  { %v1267_v33 = vpack.c.bf16 %v1221_v29, %v1219_v28  ;;  %v1123_v1 = vpop.f32.mrb[136].mxu0  ;;  %1522 = vadd.xlane.f32.xlu1 %v1521_v30  ;;  %1519 = vadd.xlane.f32.xlu0 %v1518_v31 }
 0x333   :  { %v1124_v35 = vadd.f32 %v1123_v1, %v3442_v39  ;;  %v1125_v38 = vpop.f32.mrb[137].mxu0  ;;  %v1334_v36 = vunpack.c.h.bf16 %v1266_v32  ;;  %v1332_v40 = vunpack.c.l.bf16 %v1266_v32 }
 0x334   :  { %v1126_v41 = vadd.f32 %v1125_v38, %v3444_v37  ;;  %v1127_v42 = vpop.f32.mrb[138].mxu0  ;;  %1916 = vmatprep.mubr.bf16.mxu1 %v1267_v33  ;;  %v1335_v43 = vunpack.c.h.bf16 %v1267_v33  ;;  %v1333_v44 = vunpack.c.l.bf16 %v1267_v33 }
 0x335   :  { %v1128_v45 = vadd.f32 %v1127_v42, %v3442_v39  ;;  %v1129_v46 = vpop.f32.mrb[139].mxu0  ;;  %1917 = vmatmul.mubr.bf16.gmra.mrb[128].mxu1 %v1266_v32  ;;  %v1422_v47 = vmul.f32 %v3453_v53, %v1334_v36  ;;  %v1420_v48 = vmul.f32 %v3453_v53, %v1332_v40  ;;  %v1222_v52 = vmax.f32 %v1124_v35, 0.0 }
 0x336   :  { %v1130_v49 = vadd.f32 %v1129_v46, %v3444_v37  ;;  %v1423_v50 = vmul.f32 %v3455_v56, %v1335_v43  ;;  %v1421_v51 = vmul.f32 %v3455_v56, %v1333_v44  ;;  %v1223_v55 = vmax.f32 %v1126_v41, 0.0 }
 0x337   :  { %v1224_v54 = vmax.f32 %v1128_v45, 0.0 }
 0x338   :  { %v1225_v57 = vmax.f32 %v1130_v49, 0.0  ;;  %v1527_v58 = vadd.f32 %v1423_v50, %v1422_v47  ;;  %v1524_v59 = vadd.f32 %v1421_v51, %v1420_v48 }
 0x339   :  { %v1268_v60 = vpack.c.bf16 %v1224_v54, %v1222_v52 }
 0x33a   :  { %v1269_v61 = vpack.c.bf16 %v1225_v57, %v1223_v55  ;;  %v1133_v62 = vpop.f32.mrb[140].mxu0  ;;  %1528 = vadd.xlane.f32.xlu1 %v1527_v58  ;;  %1525 = vadd.xlane.f32.xlu0 %v1524_v59 }
 0x33b   :  { %v1134_v63 = vadd.f32 %v1133_v62, %v3442_v39  ;;  %v1135_v0 = vpop.f32.mrb[141].mxu0  ;;  %v1338_v2 = vunpack.c.h.bf16 %v1268_v60  ;;  %v1336_v3 = vunpack.c.l.bf16 %v1268_v60 }
 0x33c   :  { %v1136_v4 = vadd.f32 %v1135_v0, %v3444_v37  ;;  %v1137_v5 = vpop.f32.mrb[142].mxu0  ;;  %1924 = vmatprep.mubr.bf16.mxu1 %v1269_v61  ;;  %v1339_v6 = vunpack.c.h.bf16 %v1269_v61  ;;  %v1337_v7 = vunpack.c.l.bf16 %v1269_v61 }
 0x33d   :  { %v1138_v8 = vadd.f32 %v1137_v5, %v3442_v39  ;;  %v1139_v9 = vpop.f32.mrb[143].mxu0  ;;  %1925 = vmatmul.mubr.bf16.gmra.mrb[132].mxu1 %v1268_v60  ;;  %v1426_v10 = vmul.f32 %v3453_v53, %v1338_v2  ;;  %v1424_v11 = vmul.f32 %v3453_v53, %v1336_v3  ;;  %v1226_v15 = vmax.f32 %v1134_v63, 0.0 }
 0x33e   :  { %v1140_v12 = vadd.f32 %v1139_v9, %v3444_v37  ;;  %v1427_v13 = vmul.f32 %v3455_v56, %v1339_v6  ;;  %v1425_v14 = vmul.f32 %v3455_v56, %v1337_v7  ;;  %v1227_v17 = vmax.f32 %v1136_v4, 0.0 }
 0x33f   :  { %v1228_v16 = vmax.f32 %v1138_v8, 0.0 }
 0x340   :  { %v1229_v18 = vmax.f32 %v1140_v12, 0.0  ;;  %v1533_v19 = vadd.f32 %v1427_v13, %v1426_v10  ;;  %v1530_v20 = vadd.f32 %v1425_v14, %v1424_v11 }
 0x341   :  { %v1270_v21 = vpack.c.bf16 %v1228_v16, %v1226_v15 }
 0x342   :  { %v1271_v22 = vpack.c.bf16 %v1229_v18, %v1227_v17  ;;  %v1143_v23 = vpop.f32.mrb[144].mxu0  ;;  %1534 = vadd.xlane.f32.xlu1 %v1533_v19  ;;  %1531 = vadd.xlane.f32.xlu0 %v1530_v20 }
 0x343   :  { %v1144_v24 = vadd.f32 %v1143_v23, %v3442_v39  ;;  %v1145_v25 = vpop.f32.mrb[145].mxu0  ;;  %v1342_v26 = vunpack.c.h.bf16 %v1270_v21  ;;  %v1340_v27 = vunpack.c.l.bf16 %v1270_v21  ;;  %v3605_v23 = vld [vmem:[#allocation2] ss:$0 sm:$0xff] }
 0x344   :  { %v1146_v28 = vadd.f32 %v1145_v25, %v3444_v37  ;;  %v1147_v29 = vpop.f32.mrb[146].mxu0  ;;  %1932 = vmatprep.mubr.bf16.mxu1 %v1271_v22  ;;  %v1343_v30 = vunpack.c.h.bf16 %v1271_v22  ;;  %v1341_v31 = vunpack.c.l.bf16 %v1271_v22 }
 0x345   :  { %v1148_v32 = vadd.f32 %v1147_v29, %v3442_v39  ;;  %v1149_v33 = vpop.f32.mrb[147].mxu0  ;;  %1933 = vmatmul.mubr.bf16.gmra.mrb[136].mxu1 %v1270_v21  ;;  %v1430_v1 = vmul.f32 %v3453_v53, %v1342_v26  ;;  %v1428_v35 = vmul.f32 %v3453_v53, %v1340_v27  ;;  %v1230_v41 = vmax.f32 %v1144_v24, 0.0 }
 0x346   :  { %v1150_v38 = vadd.f32 %v1149_v33, %v3444_v37  ;;  %v1431_v36 = vmul.f32 %v3455_v56, %v1343_v30  ;;  %v1429_v40 = vmul.f32 %v3455_v56, %v1341_v31  ;;  %v1231_v43 = vmax.f32 %v1146_v28, 0.0 }
 0x347   :  { %v1232_v42 = vmax.f32 %v1148_v32, 0.0 }
 0x348   :  { %v1233_v44 = vmax.f32 %v1150_v38, 0.0  ;;  %v1539_v45 = vadd.f32 %v1431_v36, %v1430_v1  ;;  %v1536_v46 = vadd.f32 %v1429_v40, %v1428_v35 }
 0x349   :  { %v1272_v47 = vpack.c.bf16 %v1232_v42, %v1230_v41 }
 0x34a   :  { %v1273_v48 = vpack.c.bf16 %v1233_v44, %v1231_v43  ;;  %v1153_v49 = vpop.f32.mrb[148].mxu0  ;;  %1540 = vadd.xlane.f32.xlu1 %v1539_v45  ;;  %1537 = vadd.xlane.f32.xlu0 %v1536_v46 }
 0x34b   :  { %v1154_v50 = vadd.f32 %v1153_v49, %v3442_v39  ;;  %v1155_v51 = vpop.f32.mrb[149].mxu0  ;;  %v1346_v52 = vunpack.c.h.bf16 %v1272_v47  ;;  %v1344_v54 = vunpack.c.l.bf16 %v1272_v47 }
 0x34c   :  { %v1156_v55 = vadd.f32 %v1155_v51, %v3444_v37  ;;  %v1157_v57 = vpop.f32.mrb[150].mxu0  ;;  %1940 = vmatprep.mubr.bf16.mxu1 %v1273_v48  ;;  %v1347_v58 = vunpack.c.h.bf16 %v1273_v48  ;;  %v1345_v59 = vunpack.c.l.bf16 %v1273_v48 }
 0x34d   :  { %v1158_v60 = vadd.f32 %v1157_v57, %v3442_v39  ;;  %v1159_v61 = vpop.f32.mrb[151].mxu0  ;;  %1941 = vmatmul.mubr.bf16.gmra.mrb[140].mxu1 %v1272_v47  ;;  %v1434_v62 = vmul.f32 %v3453_v53, %v1346_v52  ;;  %v1432_v63 = vmul.f32 %v3453_v53, %v1344_v54  ;;  %v1234_v4 = vmax.f32 %v1154_v50, 0.0 }
 0x34e   :  { %v1160_v0 = vadd.f32 %v1159_v61, %v3444_v37  ;;  %v1435_v2 = vmul.f32 %v3455_v56, %v1347_v58  ;;  %v1433_v3 = vmul.f32 %v3455_v56, %v1345_v59  ;;  %v1235_v6 = vmax.f32 %v1156_v55, 0.0 }
 0x34f   :  { %v1236_v5 = vmax.f32 %v1158_v60, 0.0 }
 0x350   :  { %v1237_v7 = vmax.f32 %v1160_v0, 0.0  ;;  %v1545_v8 = vadd.f32 %v1435_v2, %v1434_v62  ;;  %v1542_v9 = vadd.f32 %v1433_v3, %v1432_v63 }
 0x351   :  { %v1274_v10 = vpack.c.bf16 %v1236_v5, %v1234_v4 }
 0x352   :  { %v1275_v39 = vpack.c.bf16 %v1237_v7, %v1235_v6  ;;  %1546 = vadd.xlane.f32.xlu1 %v1545_v8  ;;  %1543 = vadd.xlane.f32.xlu0 %v1542_v9 }
 0x353   :  { %v1350_v11 = vunpack.c.h.bf16 %v1274_v10  ;;  %v1348_v12 = vunpack.c.l.bf16 %v1274_v10 }
 0x354   :  { %1948 = vmatprep.mubr.bf16.mxu1 %v1275_v39  ;;  %v1351_v13 = vunpack.c.h.bf16 %v1275_v39  ;;  %v1349_v14 = vunpack.c.l.bf16 %v1275_v39 }
 0x355   :  { %1949 = vmatmul.mubr.bf16.gmra.mrb[144].mxu1 %v1274_v10  ;;  %v1438_v37 = vmul.f32 %v3453_v53, %v1350_v11  ;;  %v1436_v15 = vmul.f32 %v3453_v53, %v1348_v12 }
 0x356   :  { %v1439_v16 = vmul.f32 %v3455_v56, %v1351_v13  ;;  %v1437_v17 = vmul.f32 %v3455_v56, %v1349_v14 }
 0x357   :  { %v1442_v20 = vpop.xlane.xlu0 %1441 }
 0x358   :  { %v1551_v18 = vadd.f32 %v1439_v16, %v1438_v37  ;;  %v1548_v19 = vadd.f32 %v1437_v17, %v1436_v15  ;;  %v1561_v53 = vadd.f32 %v3605_v23, %v1442_v20  ;;  %v3629_v16 = vld [vmem:[%s4147_s10] ss:$0 sm:$0xff] }
 0x35a   :  { %1552 = vadd.xlane.f32.xlu1 %v1551_v18  ;;  %1549 = vadd.xlane.f32.xlu0 %v1548_v19  ;;  %v1599_v30 = vmax.f32 %v1561_v53, 0.0 }
 0x35b   :  { %v1445_v22 = vpop.xlane.xlu0 %1444 }
 0x35c   :  { %v1562_v24 = vadd.f32 %v3605_v23, %v1445_v22 }
 0x35e   :  { %v1600_v26 = vmax.f32 %v1562_v24, 0.0 }
 0x35f   :  { %v1448_v21 = vpop.xlane.xlu1 %1447 }
 0x360   :  { %v1563_v27 = vadd.f32 %v3605_v23, %v1448_v21 }
 0x362   :  { %v1601_v56 = vmax.f32 %v1563_v27, 0.0 }
 0x363   :  { %v1451_v25 = vpop.xlane.xlu1 %1450 }
 0x364   :  { %v1564_v29 = vadd.f32 %v3605_v23, %v1451_v25 }
 0x366   :  { %v1602_v1 = vmax.f32 %v1564_v29, 0.0 }
 0x367   :  { %v1457_v28 = vpop.xlane.xlu1 %1456  ;;  %v1454_v31 = vpop.xlane.xlu0 %1453 }
 0x368   :  { %v1565_v35 = vadd.f32 %v3605_v23, %v1454_v31  ;;  %v1566_v40 = vadd.f32 %v3605_v23, %v1457_v28 }
 0x36a   :  { %v1603_v41 = vmax.f32 %v1565_v35, 0.0  ;;  %v1604_v45 = vmax.f32 %v1566_v40, 0.0 }
 0x36b   :  { %2002 = vperm.xlu1 %2825, %v1600_v26  }
 0x36f   :  { %v1463_v32 = vpop.xlane.xlu1 %1462  ;;  %2007 = vperm.xlu1 %2825, %v1601_v56   ;;  %v1460_v36 = vpop.xlane.xlu0 %1459 }
 0x370   :  { %v1568_v33 = vadd.f32 %v3605_v23, %v1463_v32  ;;  %1997 = vperm.xlu0 %2824, %v1599_v30   ;;  %v1567_v46 = vadd.f32 %v3605_v23, %v1460_v36 }
 0x372   :  { %v1606_v38 = vmax.f32 %v1568_v33, 0.0  ;;  %v1605_v49 = vmax.f32 %v1567_v46, 0.0 }
 0x373   :  { %2012 = vperm.xlu1 %2825, %v1602_v1  }
 0x374   :  { %2032 = vperm.xlu0 %2824, %v1606_v38  }
 0x377   :  { %v1469_v42 = vpop.xlane.xlu1 %1468  ;;  %2017 = vperm.xlu1 %2825, %v1603_v41   ;;  %v1466_v43 = vpop.xlane.xlu0 %1465 }
 0x378   :  { %v1569_v44 = vadd.f32 %v3605_v23, %v1466_v43  ;;  %v1570_v47 = vadd.f32 %v3605_v23, %v1469_v42 }
 0x37a   :  { %v1607_v48 = vmax.f32 %v1569_v44, 0.0  ;;  %v1608_v50 = vmax.f32 %v1570_v47, 0.0 }
 0x37b   :  { %2022 = vperm.xlu1 %2825, %v1604_v45  }
 0x37c   :  { %2037 = vperm.xlu0 %2824, %v1607_v48  }
 0x37f   :  { %v1475_v51 = vpop.xlane.xlu1 %1474  ;;  %2027 = vperm.xlu1 %2825, %v1605_v49   ;;  %v1472_v52 = vpop.xlane.xlu0 %1471 }
 0x380   :  { %v1571_v54 = vadd.f32 %v3605_v23, %v1472_v52  ;;  %2042 = vperm.xlu0 %2824, %v1608_v50   ;;  %v1572_v55 = vadd.f32 %v3605_v23, %v1475_v51 }
 0x382   :  { %v1609_v57 = vmax.f32 %v1571_v54, 0.0  ;;  %v1610_v58 = vmax.f32 %v1572_v55, 0.0 }
 0x384   :  { %2047 = vperm.xlu0 %2824, %v1609_v57  }
 0x387   :  { %v1481_v59 = vpop.xlane.xlu1 %1480  ;;  %v1478_v60 = vpop.xlane.xlu0 %1477 }
 0x388   :  { %v1573_v61 = vadd.f32 %v3605_v23, %v1478_v60  ;;  %2052 = vperm.xlu0 %2824, %v1610_v58   ;;  %v1574_v62 = vadd.f32 %v3605_v23, %v1481_v59 }
 0x38a   :  { %v1611_v63 = vmax.f32 %v1573_v61, 0.0  ;;  %v1612_v0 = vmax.f32 %v1574_v62, 0.0 }
 0x38c   :  { %2057 = vperm.xlu0 %2824, %v1611_v63  }
 0x38f   :  { %v1484_v2 = vpop.xlane.xlu0 %1483  ;;  %v3622_v5 = vpop.xlane.xlu1 %1486 }
 0x390   :  { %v1575_v3 = vadd.f32 %v3605_v23, %v1484_v2  ;;  %2062 = vperm.xlu0 %2824, %v1612_v0  }
 0x392   :  { %v1613_v4 = vmax.f32 %v1575_v3, 0.0 }
 0x394   :  { %2067 = vperm.xlu0 %2824, %v1613_v4  }
 0x397   :  { %v1493_v6 = vpop.xlane.xlu1 %1492  ;;  %v1490_v7 = vpop.xlane.xlu0 %1489 }
 0x398   :  { %v1577_v8 = vadd.f32 %v3605_v23, %v1490_v7  ;;  %v1806_v9 = vpop.f32.mrb[152].mxu0  ;;  %v1578_v39 = vadd.f32 %v3605_v23, %v1493_v6 }
 0x399   :  { %v1808_v10 = vpop.f32.mrb[153].mxu0  ;;  %v3637_v25 = vadd.f32 %v3629_v16, %v1806_v9 }
 0x39a   :  { %v1615_v11 = vmax.f32 %v1577_v8, 0.0  ;;  %v1809_v12 = vpop.f32.mrb[154].mxu0  ;;  %v1616_v14 = vmax.f32 %v1578_v39, 0.0 }
 0x39b   :  { %v1811_v13 = vpop.f32.mrb[155].mxu0  ;;  %v3633_v19 = vadd.f32 %v3629_v16, %v1809_v12  ;;  %v4178_v56 = vmax.f32 %v3637_v25, 0.0 }
 0x39c   :  { %2077 = vperm.xlu0 %2824, %v1615_v11  }
 0x39d   :  { %v4184_v53 = vmax.f32 %v3633_v19, 0.0 }
 0x39f   :  { %v1499_v37 = vpop.xlane.xlu1 %1498  ;;  %v1496_v15 = vpop.xlane.xlu0 %1495  ;;  %v2338_v1 = vadd.f32 %v4184_v53, %v4178_v56 }
 0x3a0   :  { %v1579_v17 = vadd.f32 %v3605_v23, %v1496_v15  ;;  %v1814_v18 = vpop.f32.mrb[76].mxu1  ;;  %2082 = vperm.xlu0 %2824, %v1616_v14   ;;  %v1580_v21 = vadd.f32 %v3605_v23, %v1499_v37 }
 0x3a1   :  { %v1816_v20 = vpop.f32.mrb[77].mxu1  ;;  %v3640_v26 = vadd.f32 %v3629_v16, %v1814_v18 }
 0x3a2   :  { %v1617_v22 = vmax.f32 %v1579_v17, 0.0  ;;  %v1817_v24 = vpop.f32.mrb[78].mxu1  ;;  %v1618_v28 = vmax.f32 %v1580_v21, 0.0 }
 0x3a3   :  { %v1819_v27 = vpop.f32.mrb[79].mxu1  ;;  %v4179_v29 = vmax.f32 %v3640_v26, 0.0  ;;  %v3646_v30 = vadd.f32 %v3629_v16, %v1817_v24 }
 0x3a4   :  { %2087 = vperm.xlu0 %2824, %v1617_v22  }
 0x3a5   :  { %v2339_v41 = vadd.f32 %v2338_v1, %v4179_v29  ;;  %v4177_v42 = vmax.f32 %v3646_v30, 0.0 }
 0x3a7   :  { %v1505_v31 = vpop.xlane.xlu1 %1504  ;;  %v2340_v46 = vadd.f32 %v2339_v41, %v4177_v42 }
 0x3a8   :  { %v1582_v32 = vadd.f32 %v3605_v23, %v1505_v31  ;;  %v1822_v33 = vpop.f32.mrb[80].mxu1  ;;  %2092 = vperm.xlu0 %2824, %v1618_v28  }
 0x3a9   :  { %v3654_v35 = vadd.f32 %v3629_v16, %v1822_v33  ;;  %v1824_v38 = vpop.f32.mrb[81].mxu1 }
 0x3aa   :  { %v1620_v36 = vmax.f32 %v1582_v32, 0.0  ;;  %v1825_v40 = vpop.f32.mrb[82].mxu1 }
 0x3ab   :  { %v1827_v43 = vpop.f32.mrb[83].mxu1  ;;  %v4174_v44 = vmax.f32 %v3654_v35, 0.0  ;;  %v3661_v45 = vadd.f32 %v3629_v16, %v1825_v40 }
 0x3ac   :  { %2102 = vperm.xlu0 %2824, %v1620_v36  }
 0x3ad   :  { %v2341_v50 = vadd.f32 %v2340_v46, %v4174_v44  ;;  %v4173_v51 = vmax.f32 %v3661_v45, 0.0  ;;  %v3711_v46 = vpop.xlane.xlu0 %1501 }
 0x3af   :  { %v1511_v47 = vpop.xlane.xlu1 %1510  ;;  %v2342_v61 = vadd.f32 %v2341_v50, %v4173_v51 }
 0x3b0   :  { %v1584_v48 = vadd.f32 %v3605_v23, %v1511_v47  ;;  %v1830_v49 = vpop.f32.mrb[84].mxu1 }
 0x3b1   :  { %v3670_v52 = vadd.f32 %v3629_v16, %v1830_v49  ;;  %v1832_v54 = vpop.f32.mrb[85].mxu1 }
 0x3b2   :  { %v1622_v55 = vmax.f32 %v1584_v48, 0.0  ;;  %v1833_v57 = vpop.f32.mrb[86].mxu1 }
 0x3b3   :  { %v4170_v58 = vmax.f32 %v3670_v52, 0.0  ;;  %v3674_v59 = vadd.f32 %v3629_v16, %v1833_v57  ;;  %v1835_v60 = vpop.f32.mrb[87].mxu1 }
 0x3b4   :  { %2112 = vperm.xlu0 %2824, %v1622_v55   ;;  %v3721_v55 = vpop.xlane.xlu0 %1507 }
 0x3b5   :  { %v2343_v62 = vadd.f32 %v2342_v61, %v4170_v58  ;;  %v1964_v63 = vmax.f32 %v3674_v59, 0.0 }
 0x3b7   :  { %v1517_v0 = vpop.xlane.xlu1 %1516  ;;  %v2344_v9 = vadd.f32 %v2343_v62, %v1964_v63 }
 0x3b8   :  { %v1586_v2 = vadd.f32 %v3605_v23, %v1517_v0  ;;  %v1838_v3 = vpop.f32.mrb[88].mxu1 }
 0x3b9   :  { %v3683_v4 = vadd.f32 %v3629_v16, %v1838_v3  ;;  %v1840_v6 = vpop.f32.mrb[89].mxu1 }
 0x3ba   :  { %v1624_v7 = vmax.f32 %v1586_v2, 0.0  ;;  %v1841_v8 = vpop.f32.mrb[90].mxu1 }
 0x3bb   :  { %v1965_v10 = vmax.f32 %v3683_v4, 0.0  ;;  %v3689_v39 = vadd.f32 %v3629_v16, %v1841_v8  ;;  %v1843_v11 = vpop.f32.mrb[91].mxu1 }
 0x3bc   :  { %2122 = vperm.xlu0 %2824, %v1624_v7   ;;  %v3728_v7 = vpop.xlane.xlu0 %1513 }
 0x3bd   :  { %v2345_v12 = vadd.f32 %v2344_v9, %v1965_v10  ;;  %v4169_v13 = vmax.f32 %v3689_v39, 0.0 }
 0x3bf   :  { %v1523_v14 = vpop.xlane.xlu1 %1522  ;;  %v2346_v22 = vadd.f32 %v2345_v12, %v4169_v13 }
 0x3c0   :  { %v1588_v37 = vadd.f32 %v3605_v23, %v1523_v14  ;;  %v1846_v15 = vpop.f32.mrb[92].mxu1 }
 0x3c1   :  { %v3696_v17 = vadd.f32 %v3629_v16, %v1846_v15  ;;  %v1848_v18 = vpop.f32.mrb[93].mxu1 }
 0x3c2   :  { %v1626_v20 = vmax.f32 %v1588_v37, 0.0  ;;  %v1849_v21 = vpop.f32.mrb[94].mxu1  ;;  %v3738_v37 = vpop.xlane.xlu0 %1519 }
 0x3c3   :  { %v4166_v24 = vmax.f32 %v3696_v17, 0.0  ;;  %v3702_v27 = vadd.f32 %v3629_v16, %v1849_v21  ;;  %v1851_v28 = vpop.f32.mrb[95].mxu1 }
 0x3c4   :  { %2132 = vperm.xlu0 %2824, %v1626_v20  }
 0x3c5   :  { %v2347_v31 = vadd.f32 %v2346_v22, %v4166_v24  ;;  %v4165_v32 = vmax.f32 %v3702_v27, 0.0 }
 0x3c7   :  { %v1529_v33 = vpop.xlane.xlu1 %1528  ;;  %v2348_v47 = vadd.f32 %v2347_v31, %v4165_v32 }
 0x3c8   :  { %v1590_v1 = vadd.f32 %v3605_v23, %v1529_v33  ;;  %v1854_v38 = vpop.f32.mrb[96].mxu1 }
 0x3c9   :  { %v3709_v36 = vadd.f32 %v3629_v16, %v1854_v38  ;;  %v1856_v40 = vpop.f32.mrb[97].mxu1 }
 0x3ca   :  { %v1628_v41 = vmax.f32 %v1590_v1, 0.0  ;;  %v1857_v43 = vpop.f32.mrb[98].mxu1  ;;  %v3745_v1 = vpop.xlane.xlu0 %1525 }
 0x3cb   :  { %v4160_v48 = vmax.f32 %v3709_v36, 0.0  ;;  %v3717_v49 = vadd.f32 %v3629_v16, %v1857_v43  ;;  %v1859_v50 = vpop.f32.mrb[99].mxu1 }
 0x3cc   :  { %2142 = vperm.xlu0 %2824, %v1628_v41  }
 0x3cd   :  { %v2349_v54 = vadd.f32 %v2348_v47, %v4160_v48  ;;  %v4157_v57 = vmax.f32 %v3717_v49, 0.0 }
 0x3cf   :  { %v1535_v60 = vpop.xlane.xlu1 %1534  ;;  %v2350_v8 = vadd.f32 %v2349_v54, %v4157_v57  ;;  %v3755_v50 = vpop.xlane.xlu0 %1531 }
 0x3d0   :  { %v1592_v61 = vadd.f32 %v3605_v23, %v1535_v60  ;;  %v1862_v62 = vpop.f32.mrb[100].mxu1 }
 0x3d1   :  { %v3726_v0 = vadd.f32 %v3629_v16, %v1862_v62  ;;  %v1864_v2 = vpop.f32.mrb[101].mxu1 }
 0x3d2   :  { %v1630_v3 = vmax.f32 %v1592_v61, 0.0  ;;  %v1865_v6 = vpop.f32.mrb[102].mxu1 }
 0x3d3   :  { %v4156_v9 = vmax.f32 %v3726_v0, 0.0  ;;  %v3734_v11 = vadd.f32 %v3629_v16, %v1865_v6  ;;  %v1867_v12 = vpop.f32.mrb[103].mxu1 }
 0x3d4   :  { %2152 = vperm.xlu0 %2824, %v1630_v3  }
 0x3d5   :  { %4203 = vst [vmem:[#allocation12_spill] sm:$0xff] %v3734_v11  ;;  %v2351_v14 = vadd.f32 %v2350_v8, %v4156_v9  ;;  %v4149_v15 = vmax.f32 %v3734_v11, 0.0 }
 0x3d7   :  { %v1541_v18 = vpop.xlane.xlu1 %1540  ;;  %v2352_v38 = vadd.f32 %v2351_v14, %v4149_v15  ;;  %v3762_v12 = vpop.xlane.xlu0 %1537 }
 0x3d8   :  { %v1594_v20 = vadd.f32 %v3605_v23, %v1541_v18  ;;  %v1870_v21 = vpop.f32.mrb[104].mxu1 }
 0x3d9   :  { %v3743_v22 = vadd.f32 %v3629_v16, %v1870_v21  ;;  %v1872_v28 = vpop.f32.mrb[105].mxu1 }
 0x3da   :  { %v1632_v31 = vmax.f32 %v1594_v20, 0.0  ;;  %v1873_v33 = vpop.f32.mrb[106].mxu1 }
 0x3db   :  { %v4155_v40 = vmax.f32 %v3743_v22, 0.0  ;;  %v3751_v41 = vadd.f32 %v3629_v16, %v1873_v33  ;;  %v1875_v43 = vpop.f32.mrb[107].mxu1 }
 0x3dc   :  { %2162 = vperm.xlu0 %2824, %v1632_v31  }
 0x3dd   :  { %v2353_v47 = vadd.f32 %v2352_v38, %v4155_v40  ;;  %v4152_v54 = vmax.f32 %v3751_v41, 0.0 }
 0x3df   :  { %v1547_v60 = vpop.xlane.xlu1 %1546  ;;  %v2354_v14 = vadd.f32 %v2353_v47, %v4152_v54  ;;  %v3772_v31 = vpop.xlane.xlu0 %1543 }
 0x3e0   :  { %v1596_v61 = vadd.f32 %v3605_v23, %v1547_v60  ;;  %v1878_v62 = vpop.f32.mrb[108].mxu1 }
 0x3e1   :  { %v3760_v2 = vadd.f32 %v3629_v16, %v1878_v62  ;;  %v1880_v3 = vpop.f32.mrb[109].mxu1 }
 0x3e2   :  { %v1634_v6 = vmax.f32 %v1596_v61, 0.0  ;;  %v1881_v8 = vpop.f32.mrb[110].mxu1 }
 0x3e3   :  { %v4151_v18 = vmax.f32 %v3760_v2, 0.0  ;;  %v3768_v20 = vadd.f32 %v3629_v16, %v1881_v8  ;;  %v1883_v21 = vpop.f32.mrb[111].mxu1 }
 0x3e4   :  { %2172 = vperm.xlu0 %2824, %v1634_v6  }
 0x3e5   :  { %v2355_v28 = vadd.f32 %v2354_v14, %v4151_v18  ;;  %v4150_v33 = vmax.f32 %v3768_v20, 0.0 }
 0x3e7   :  { %v1553_v38 = vpop.xlane.xlu1 %1552  ;;  %v2356_v6 = vadd.f32 %v2355_v28, %v4150_v33  ;;  %v3781_v8 = vpop.xlane.xlu0 %1549 }
 0x3e8   :  { %v1598_v43 = vadd.f32 %v3605_v23, %v1553_v38  ;;  %v1886_v60 = vpop.f32.mrb[112].mxu1 }
 0x3e9   :  { %v3777_v47 = vadd.f32 %v3629_v16, %v1886_v60  ;;  %v1888_v61 = vpop.f32.mrb[113].mxu1 }
 0x3ea   :  { %v1636_v62 = vmax.f32 %v1598_v43, 0.0  ;;  %v1889_v3 = vpop.f32.mrb[114].mxu1 }
 0x3eb   :  { %4204 = vst [vmem:[#allocation13_spill] sm:$0xff] %v3777_v47  ;;  %v4153_v14 = vmax.f32 %v3777_v47, 0.0  ;;  %v3785_v21 = vadd.f32 %v3629_v16, %v1889_v3  ;;  %v1891_v15 = vpop.f32.mrb[115].mxu1 }
 0x3ec   :  { %2182 = vperm.xlu0 %2824, %v1636_v62  }
 0x3ed   :  { %v2357_v38 = vadd.f32 %v2356_v6, %v4153_v14  ;;  %v4154_v60 = vmax.f32 %v3785_v21, 0.0 }
 0x3ef   :  { %v2358_v43 = vadd.f32 %v2357_v38, %v4154_v60  ;;  %v3792_v61 = vpop.permute.xlu0 %1997 }
 0x3f0   :  { %v1894_v28 = vpop.f32.mrb[116].mxu1 }
 0x3f1   :  { %v3795_v33 = vadd.f32 %v3629_v16, %v1894_v28  ;;  %v1896_v18 = vpop.f32.mrb[117].mxu1 }
 0x3f2   :  { %v1897_v54 = vpop.f32.mrb[118].mxu1 }
 0x3f3   :  { %4205 = vst [vmem:[#allocation14_spill] sm:$0xff] %v3795_v33  ;;  %v4158_v3 = vmax.f32 %v3795_v33, 0.0  ;;  %v3799_v15 = vadd.f32 %v3629_v16, %v1897_v54  ;;  %v1899_v62 = vpop.f32.mrb[119].mxu1  ;;  %v2033_v6 = vpop.permute.xlu0 %2032 }
 0x3f4   :  { %v3806_v60 = vadd.f32 %v2033_v6, %v1964_v63 }
 0x3f5   :  { %4206 = vst [vmem:[#allocation15_spill] sm:$0xff] %v3799_v15  ;;  %v2359_v14 = vadd.f32 %v2358_v43, %v4158_v3  ;;  %v4159_v38 = vmax.f32 %v3799_v15, 0.0 }
 0x3f6   :  { %4207 = vst [vmem:[#allocation16_spill] sm:$0xff] %v3806_v60 }
 0x3f7   :  { %v2360_v18 = vadd.f32 %v2359_v14, %v4159_v38 }
 0x3f8   :  { %v1902_v28 = vpop.f32.mrb[120].mxu1 }
 0x3f9   :  { %v3811_v40 = vadd.f32 %v3629_v16, %v1902_v28  ;;  %v1904_v54 = vpop.f32.mrb[121].mxu1 }
 0x3fa   :  { %v1905_v9 = vpop.f32.mrb[122].mxu1 }
 0x3fb   :  { %4208 = vst [vmem:[#allocation17_spill] sm:$0xff] %v3811_v40  ;;  %v4161_v62 = vmax.f32 %v3811_v40, 0.0  ;;  %v3815_v57 = vadd.f32 %v3629_v16, %v1905_v9  ;;  %v1907_v43 = vpop.f32.mrb[123].mxu1  ;;  %v2038_v3 = vpop.permute.xlu0 %2037 }
 0x3fc   :  { %v3822_v14 = vadd.f32 %v2038_v3, %v1965_v10 }
 0x3fd   :  { %4209 = vst [vmem:[#allocation18_spill] sm:$0xff] %v3815_v57  ;;  %v2361_v59 = vadd.f32 %v2360_v18, %v4161_v62  ;;  %v4162_v63 = vmax.f32 %v3815_v57, 0.0  ;;  %v4228_v57 = vmax.f32 %v3661_v45, 0.0  ;;  %v4234_v45 = vmax.f32 %v3717_v49, 0.0 }
 0x3fe   :  { %4210 = vst [vmem:[#allocation19_spill] sm:$0xff] %v3822_v14  ;;  %v4239_v49 = vmax.f32 %v3768_v20, 0.0 }
 0x3ff   :  { %v2362_v6 = vadd.f32 %v2361_v59, %v4162_v63 }
 0x400   :  { %v1910_v28 = vpop.f32.mrb[124].mxu1 }
 0x401   :  { %v3827_v54 = vadd.f32 %v3629_v16, %v1910_v28  ;;  %v1912_v9 = vpop.f32.mrb[125].mxu1 }
 0x402   :  { %v1913_v38 = vpop.f32.mrb[126].mxu1 }
 0x403   :  { %4211 = vst [vmem:[#allocation20_spill] sm:$0xff] %v3827_v54  ;;  %v4163_v43 = vmax.f32 %v3827_v54, 0.0  ;;  %v3831_v48 = vadd.f32 %v3629_v16, %v1913_v38  ;;  %v1915_v18 = vpop.f32.mrb[127].mxu1 }
 0x405   :  { %4212 = vst [vmem:[#allocation21_spill] sm:$0xff] %v3831_v48  ;;  %v2363_v4 = vadd.f32 %v2362_v6, %v4163_v43  ;;  %v4164_v10 = vmax.f32 %v3831_v48, 0.0 }
 0x407   :  { %v2364_v3 = vadd.f32 %v2363_v4, %v4164_v10 }
 0x408   :  { %v1918_v59 = vpop.f32.mrb[128].mxu1 }
 0x409   :  { %v3839_v28 = vadd.f32 %v3629_v16, %v1918_v59  ;;  %v1920_v9 = vpop.f32.mrb[129].mxu1 }
 0x40a   :  { %v1921_v62 = vpop.f32.mrb[130].mxu1 }
 0x40b   :  { %4213 = vst [vmem:[#allocation22_spill] sm:$0xff] %v3839_v28  ;;  %v4167_v63 = vmax.f32 %v3839_v28, 0.0  ;;  %v3843_v38 = vadd.f32 %v3629_v16, %v1921_v62  ;;  %v1923_v18 = vpop.f32.mrb[131].mxu1 }
 0x40d   :  { %4214 = vst [vmem:[#allocation23_spill] sm:$0xff] %v3843_v38  ;;  %v2365_v6 = vadd.f32 %v2364_v3, %v4167_v63  ;;  %v4168_v43 = vmax.f32 %v3843_v38, 0.0  ;;  %v4227_v38 = vmax.f32 %v3654_v35, 0.0  ;;  %v4233_v35 = vmax.f32 %v3709_v36, 0.0 }
 0x40e   :  { %v4238_v36 = vmax.f32 %v3760_v2, 0.0 }
 0x40f   :  { %v2366_v4 = vadd.f32 %v2365_v6, %v4168_v43 }
 0x410   :  { %v1926_v10 = vpop.f32.mrb[132].mxu1 }
 0x411   :  { %v3851_v59 = vadd.f32 %v3629_v16, %v1926_v10  ;;  %v1928_v9 = vpop.f32.mrb[133].mxu1 }
 0x412   :  { %v1929_v32 = vpop.f32.mrb[134].mxu1 }
 0x413   :  { %4215 = vst [vmem:[#allocation24_spill] sm:$0xff] %v3851_v59  ;;  %v4171_v24 = vmax.f32 %v3851_v59, 0.0  ;;  %v3855_v62 = vadd.f32 %v3629_v16, %v1929_v32  ;;  %v1931_v18 = vpop.f32.mrb[135].mxu1 }
 0x415   :  { %4216 = vst [vmem:[#allocation25_spill] sm:$0xff] %v3855_v62  ;;  %v2367_v3 = vadd.f32 %v2366_v4, %v4171_v24  ;;  %v4172_v63 = vmax.f32 %v3855_v62, 0.0 }
 0x417   :  { %v2368_v6 = vadd.f32 %v2367_v3, %v4172_v63 }
 0x418   :  { %v1934_v43 = vpop.f32.mrb[136].mxu1 }
 0x419   :  { %v3863_v10 = vadd.f32 %v3629_v16, %v1934_v43  ;;  %v1936_v9 = vpop.f32.mrb[137].mxu1 }
 0x41a   :  { %v1937_v13 = vpop.f32.mrb[138].mxu1 }
 0x41b   :  { %4217 = vst [vmem:[#allocation26_spill] sm:$0xff] %v3863_v10  ;;  %v4175_v58 = vmax.f32 %v3863_v10, 0.0  ;;  %v3867_v32 = vadd.f32 %v3629_v16, %v1937_v13  ;;  %v1939_v18 = vpop.f32.mrb[139].mxu1 }
 0x41d   :  { %4218 = vst [vmem:[#allocation27_spill] sm:$0xff] %v3867_v32  ;;  %v2369_v4 = vadd.f32 %v2368_v6, %v4175_v58  ;;  %v4176_v24 = vmax.f32 %v3867_v32, 0.0  ;;  %v4226_v32 = vmax.f32 %v3646_v30, 0.0  ;;  %v4232_v30 = vmax.f32 %v3702_v27, 0.0 }
 0x41e   :  { %v4237_v27 = vmax.f32 %v3751_v41, 0.0 }
 0x41f   :  { %v2370_v3 = vadd.f32 %v2369_v4, %v4176_v24 }
 0x420   :  { %v1942_v63 = vpop.f32.mrb[140].mxu1 }
 0x421   :  { %v3875_v43 = vadd.f32 %v3629_v16, %v1942_v63  ;;  %v1944_v9 = vpop.f32.mrb[141].mxu1  ;;  %v2261_v63 = vadd.s32 296, %v3435_v34 }
 0x422   :  { %v1945_v51 = vpop.f32.mrb[142].mxu1 }
 0x423   :  { %4219 = vst [vmem:[#allocation28_spill] sm:$0xff] %v3875_v43  ;;  %v4180_v44 = vmax.f32 %v3875_v43, 0.0  ;;  %v3879_v13 = vadd.f32 %v3629_v16, %v1945_v51  ;;  %v1947_v18 = vpop.f32.mrb[143].mxu1  ;;  %vm2299_vm2 = vcmp.lt.s32.totalorder %v2261_v63, 300  ;;  %v1585_v63 = vadd.f32 %v3605_v23, %v3728_v7 }
 0x424   :  { %v1593_v7 = vadd.f32 %v3605_v23, %v3762_v12 }
 0x425   :  { %4220 = vst [vmem:[#allocation29_spill] sm:$0xff] %v3879_v13  ;;  %v2371_v6 = vadd.f32 %v2370_v3, %v4180_v44  ;;  %v4183_v58 = vmax.f32 %v3879_v13, 0.0 }
 0x427   :  { %v2372_v4 = vadd.f32 %v2371_v6, %v4183_v58 }
 0x428   :  { %v1950_v24 = vpop.f32.mrb[144].mxu1 }
 0x429   :  { %v3888_v9 = vadd.f32 %v3629_v16, %v1950_v24  ;;  %v1952_v42 = vpop.f32.mrb[145].mxu1 }
 0x42a   :  { %v1953_v56 = vpop.f32.mrb[146].mxu1  ;;  %v1576_v42 = vadd.f32 %v3605_v23, %v3622_v5 }
 0x42b   :  { %4221 = vst [vmem:[#allocation30_spill] sm:$0xff] %v3888_v9  ;;  %v4181_v51 = vmax.f32 %v3888_v9, 0.0  ;;  %v3892_v18 = vadd.f32 %v3629_v16, %v1953_v56  ;;  %v1955_v29 = vpop.f32.mrb[147].mxu1  ;;  %v1581_v16 = vadd.f32 %v3605_v23, %v3711_v46  ;;  %v1589_v46 = vadd.f32 %v3605_v23, %v3745_v1 }
 0x42c   :  { %v1614_v24 = vmax.f32 %v1576_v42, 0.0  ;;  %v1583_v29 = vadd.f32 %v3605_v23, %v3721_v55  ;;  %v1591_v55 = vadd.f32 %v3605_v23, %v3755_v50  ;;  %v1597_v1 = vadd.f32 %v3605_v23, %v3781_v8  ;;  %v2043_v50 = vpop.permute.xlu0 %2042 }
 0x42d   :  { %4222 = vst [vmem:[#allocation31_spill] sm:$0xff] %v3892_v18  ;;  %v2373_v3 = vadd.f32 %v2372_v4, %v4181_v51  ;;  %v4182_v6 = vmax.f32 %v3892_v18, 0.0  ;;  %v1619_v56 = vmax.f32 %v1581_v16, 0.0  ;;  %v4225_v18 = vmax.f32 %v3637_v25, 0.0 }
 0x42e   :  { %v1621_v4 = vmax.f32 %v1583_v29, 0.0  ;;  %v1629_v42 = vmax.f32 %v1591_v55, 0.0  ;;  %v2003_v29 = vpop.permute.xlu1 %2002  ;;  %v4231_v25 = vmax.f32 %v3696_v17, 0.0  ;;  %v4236_v17 = vmax.f32 %v3743_v22, 0.0  ;;  %v4241_v22 = vld [vmem:[#allocation15_spill] sm:$0xff] }
 0x42f   :  { %v2337_v34 = vsel %vm2299_vm2, %v4182_v6, 0.0  ;;  %v2185_v13 = vadd.f32 %v3792_v61, %v4225_v18 }
 0x430   :  { %v2374_v44 = vadd.f32 %v2373_v3, %v2337_v34  ;;  %v1623_v3 = vmax.f32 %v1585_v63, 0.0  ;;  %v1627_v34 = vmax.f32 %v1589_v46, 0.0  ;;  %v2048_v63 = vpop.permute.xlu0 %2047 }
 0x432   :  { %2375 = vadd.xlane.f32.xlu1 %v2374_v44  ;;  %v1587_v44 = vadd.f32 %v3605_v23, %v3738_v37  ;;  %v1595_v37 = vadd.f32 %v3605_v23, %v3772_v31 }
 0x434   :  { %v1625_v5 = vmax.f32 %v1587_v44, 0.0  ;;  %v1633_v16 = vmax.f32 %v1595_v37, 0.0  ;;  %v2053_v44 = vpop.permute.xlu0 %2052 }
 0x435   :  { %v3944_v61 = vadd.f32 %v2053_v44, %v4232_v30 }
 0x443   :  { %2072 = vperm.xlu1 %2825, %v1614_v24   ;;  %v1631_v24 = vmax.f32 %v1593_v7, 0.0 }
 0x447   :  { %2097 = vperm.xlu1 %2825, %v1619_v56   ;;  %v1635_v56 = vmax.f32 %v1597_v1, 0.0 }
 0x44b   :  { %2107 = vperm.xlu1 %2825, %v1621_v4   ;;  %v2008_v4 = vpop.permute.xlu1 %2007 }
 0x44f   :  { %2117 = vperm.xlu1 %2825, %v1623_v3   ;;  %v2013_v3 = vpop.permute.xlu1 %2012 }
 0x450   :  { %v2188_v62 = vadd.f32 %v2013_v3, %v4226_v32 }
 0x453   :  { %2127 = vperm.xlu1 %2825, %v1625_v5   ;;  %v2018_v12 = vpop.permute.xlu1 %2017  ;;  %v2058_v5 = vpop.permute.xlu0 %2057 }
 0x454   :  { %v2189_v48 = vadd.f32 %v2018_v12, %v4227_v38  ;;  %v3948_v38 = vadd.f32 %v2058_v5, %v4233_v35  ;;  %v4242_v12 = vmax.f32 %v4241_v22, 0.0 }
 0x457   :  { %2137 = vperm.xlu1 %2825, %v1627_v34   ;;  %v2023_v46 = vpop.permute.xlu1 %2022  ;;  %v2063_v34 = vpop.permute.xlu0 %2062 }
 0x458   :  { %v2190_v15 = vadd.f32 %v2023_v46, %v4228_v57  ;;  %v4243_v46 = vld [vmem:[#allocation18_spill] sm:$0xff] }
 0x459   :  { %v4244_v41 = vmax.f32 %v4243_v46, 0.0 }
 0x45b   :  { %2147 = vperm.xlu1 %2825, %v1629_v42   ;;  %v2028_v55 = vpop.permute.xlu1 %2027  ;;  %v2068_v31 = vpop.permute.xlu0 %2067 }
 0x45f   :  { %2157 = vperm.xlu1 %2825, %v1631_v24   ;;  %v2078_v24 = vpop.permute.xlu0 %2077 }
 0x460   :  { %v3960_v32 = vadd.f32 %v2078_v24, %v4236_v17  ;;  %v4249_v24 = vld [vmem:[#allocation25_spill] sm:$0xff] }
 0x461   :  { %v4259_v17 = vld [vmem:[#allocation13_spill] sm:$0xff] }
 0x463   :  { %2167 = vperm.xlu1 %2825, %v1633_v16   ;;  %v2083_v1 = vpop.permute.xlu0 %2082 }
 0x467   :  { %2177 = vperm.xlu1 %2825, %v1635_v56   ;;  %v2088_v58 = vpop.permute.xlu0 %2087 }
 0x46b   :  { %v2093_v14 = vpop.permute.xlu0 %2092 }
 0x46c   :  { %v3972_v3 = vadd.f32 %v2093_v14, %v4239_v49 }
 0x46f   :  { %v2103_v9 = vpop.permute.xlu0 %2102 }
 0x473   :  { %v2113_v43 = vpop.permute.xlu0 %2112 }
 0x474   :  { %v3980_v5 = vadd.f32 %v2113_v43, %v4242_v12 }
 0x477   :  { %v2123_v59 = vpop.permute.xlu0 %2122 }
 0x47b   :  { %v2133_v54 = vpop.permute.xlu0 %2132 }
 0x47f   :  { %v2143_v40 = vpop.permute.xlu0 %2142 }
 0x4bf   :  { %v2376_v42 = vpop.xlane.xlu1 %2375 }
 0x4c0   :  { %v2377_v7 = vrot.slane %v2376_v42, 4 }
 0x4c2   :  { %v2378_v37 = vadd.f32 %v2377_v7, %v2376_v42  ;;  %v2153_v7 = vpop.permute.xlu0 %2152 }
 0x4c3   :  { %v2073_v16 = vpop.permute.xlu1 %2072 }
 0x4c4   :  { %v2379_v23 = vrot.slane %v2378_v37, 2 }
 0x4c6   :  { %v2380_v8 = vadd.f32 %v2379_v23, %v2378_v37  ;;  %v2163_v23 = vpop.permute.xlu0 %2162 }
 0x4c7   :  { %v2098_v6 = vpop.permute.xlu1 %2097 }
 0x4c8   :  { %v2381_v56 = vrot.slane %v2380_v8, 1 }
 0x4ca   :  { %v2382_v51 = vadd.f32 %v2381_v56, %v2380_v8  ;;  %v2173_v33 = vpop.permute.xlu0 %2172  ;;  %v4223_v8 = vmax.f32 %v3633_v19, 0.0  ;;  %v4224_v56 = vmax.f32 %v3640_v26, 0.0  ;;  %v4229_v19 = vmax.f32 %v3670_v52, 0.0 }
 0x4cb   :  { %v2108_v53 = vpop.permute.xlu1 %2107  ;;  %v4230_v26 = vmax.f32 %v3689_v39, 0.0  ;;  %v3952_v52 = vadd.f32 %v2063_v34, %v4234_v45  ;;  %v4235_v39 = vmax.f32 %v3726_v0, 0.0  ;;  %v4240_v0 = vmax.f32 %v3785_v21, 0.0 }
 0x4cc   :  { %2812 = vpush %v2382_v51  ;;  %v2186_v51 = vadd.f32 %v2003_v29, %v4223_v8  ;;  %v2187_v47 = vadd.f32 %v2008_v4, %v4224_v56  ;;  %v2191_v29 = vadd.f32 %v2028_v55, %v4229_v19  ;;  %v3940_v8 = vadd.f32 %v2048_v63, %v4231_v25  ;;  %v4245_v55 = vld [vmem:[#allocation21_spill] sm:$0xff]  ;;  %v4255_v25 = vld [vmem:[#allocation31_spill] sm:$0xff] }
 0x4cd   :  { %v3936_v4 = vadd.f32 %v2043_v50, %v4230_v26  ;;  %v3956_v57 = vadd.f32 %v2068_v31, %v4235_v39  ;;  %v3964_v50 = vadd.f32 %v2083_v1, %v4237_v27  ;;  %v3968_v63 = vadd.f32 %v2088_v58, %v4238_v36  ;;  %v4247_v31 = vld [vmem:[#allocation23_spill] sm:$0xff]  ;;  %v4253_v19 = vld [vmem:[#allocation29_spill] sm:$0xff]  ;;  %v4261_v36 = vld [vmem:[#allocation14_spill] sm:$0xff] }
 0x4ce   :  { %v2183_v18 = vpop.permute.xlu0 %2182  ;;  %v3976_v44 = vadd.f32 %v2103_v9, %v4240_v0  ;;  %v3984_v34 = vadd.f32 %v2123_v59, %v4244_v41  ;;  %v4246_v2 = vmax.f32 %v4245_v55, 0.0  ;;  %v4248_v20 = vmax.f32 %v4247_v31, 0.0  ;;  %v4251_v1 = vld [vmem:[#allocation27_spill] sm:$0xff]  ;;  %v4267_v55 = vld [vmem:[#allocation22_spill] sm:$0xff] }
 0x4cf   :  { %v2118_v60 = vpop.permute.xlu1 %2117  ;;  %v4250_v21 = vmax.f32 %v4249_v24, 0.0  ;;  %v4252_v56 = vmax.f32 %v4251_v1, 0.0  ;;  %v4254_v26 = vmax.f32 %v4253_v19, 0.0  ;;  %v4256_v30 = vmax.f32 %v4255_v25, 0.0 }
 0x4d0   :  { %v3988_v58 = vadd.f32 %v2133_v54, %v4246_v2  ;;  %v3992_v14 = vadd.f32 %v2143_v40, %v4248_v20  ;;  %v4257_v40 = vld [vmem:[#allocation12_spill] sm:$0xff]  ;;  %v4268_v2 = vmax.f32 %v4267_v55, 0.0 }
 0x4d1   :  { %v3996_v9 = vadd.f32 %v2153_v7, %v4250_v21  ;;  %v4000_v43 = vadd.f32 %v2163_v23, %v4252_v56  ;;  %v4004_v59 = vadd.f32 %v2173_v33, %v4254_v26  ;;  %v4008_v54 = vadd.f32 %v2183_v18, %v4256_v30  ;;  %v4263_v33 = vld [vmem:[#allocation17_spill] sm:$0xff]  ;;  %v4265_v18 = vld [vmem:[#allocation20_spill] sm:$0xff] }
 0x4d2   :  { %v4258_v45 = vmax.f32 %v4257_v40, 0.0  ;;  %v4260_v7 = vmax.f32 %v4259_v17, 0.0  ;;  %v4262_v23 = vmax.f32 %v4261_v36, 0.0  ;;  %v4264_v22 = vmax.f32 %v4263_v33, 0.0 }
 0x4d3   :  { %v2128_v10 = vpop.permute.xlu1 %2127  ;;  %v4266_v46 = vmax.f32 %v4265_v18, 0.0 }
 0x4d4   :  { %v2200_v39 = vadd.f32 %v2073_v16, %v4258_v45  ;;  %v4014_v27 = vadd.f32 %v2098_v6, %v4260_v7  ;;  %v4018_v49 = vadd.f32 %v2108_v53, %v4262_v23  ;;  %v4022_v12 = vadd.f32 %v2118_v60, %v4264_v22  ;;  %v4269_v6 = vld [vmem:[#allocation24_spill] sm:$0xff]  ;;  %v4271_v53 = vld [vmem:[#allocation26_spill] sm:$0xff] }
 0x4d5   :  { %v4026_v41 = vadd.f32 %v2128_v10, %v4266_v46  ;;  %v4270_v20 = vmax.f32 %v4269_v6, 0.0  ;;  %v4272_v21 = vmax.f32 %v4271_v53, 0.0  ;;  %v4273_v60 = vld [vmem:[#allocation28_spill] sm:$0xff]  ;;  %v4275_v10 = vld [vmem:[#allocation30_spill] sm:$0xff] }
 0x4d6   :  { %v4274_v56 = vmax.f32 %v4273_v60, 0.0  ;;  %v4276_v26 = vmax.f32 %v4275_v10, 0.0 }
 0x4d7   :  { %v2138_v28 = vpop.permute.xlu1 %2137 }
 0x4d8   :  { %v4030_v16 = vadd.f32 %v2138_v28, %v4268_v2 }
 0x4db   :  { %v2148_v42 = vpop.permute.xlu1 %2147 }
 0x4dc   :  { %v4036_v24 = vadd.f32 %v2148_v42, %v4270_v20 }
 0x4df   :  { %v2158_v37 = vpop.permute.xlu1 %2157 }
 0x4e0   :  { %v4040_v1 = vadd.f32 %v2158_v37, %v4272_v21 }
 0x4e3   :  { %v2168_v11 = vpop.permute.xlu1 %2167 }
 0x4e4   :  { %v4044_v19 = vadd.f32 %v2168_v11, %v4274_v56  ;;  %v4277_v11 = vld [vmem:[#allocation16_spill] sm:$0xff] }
 0x4e7   :  { %v2178_v35 = vpop.permute.xlu1 %2177 }
 0x4e8   :  { %v4048_v25 = vadd.f32 %v2178_v35, %v4276_v26  ;;  %v4278_v35 = vld [vmem:[#allocation19_spill] sm:$0xff] }
 0x4fd   :  { %s2813_s10 = spop %2812 }
 0x4fe   :  { %v2384_v0 = vstv %s2813_s10 }
 0x4ff   :  { %v4032_v31 = vmul.f32 0.00055555557, %v2384_v0 }
 0x501   :  { %v2386_v28 = vsub.f32 %v2185_v13, %v4032_v31  ;;  %v2387_v30 = vsub.f32 %v2186_v51, %v4032_v31  ;;  %v2388_v40 = vsub.f32 %v2187_v47, %v4032_v31  ;;  %v2389_v42 = vsub.f32 %v2188_v62, %v4032_v31 }
 0x502   :  { %v2390_v45 = vsub.f32 %v2189_v48, %v4032_v31  ;;  %v2391_v37 = vsub.f32 %v2190_v15, %v4032_v31  ;;  %v2392_v17 = vsub.f32 %v2191_v29, %v4032_v31  ;;  %v2393_v7 = vsub.f32 %v4277_v11, %v4032_v31 }
 0x503   :  { %v2394_v36 = vsub.f32 %v4278_v35, %v4032_v31  ;;  %v2395_v13 = vsub.f32 %v3936_v4, %v4032_v31  ;;  %v2396_v47 = vsub.f32 %v3940_v8, %v4032_v31  ;;  %v2397_v62 = vsub.f32 %v3944_v61, %v4032_v31  ;;  %2424 = vst [vmem:[#allocation8] sm:$0xff] %v2386_v28 }
 0x504   :  { %2425 = vst [vmem:[#allocation8 + $0x8] sm:$0xff] %v2387_v30  ;;  %2426 = vst [vmem:[#allocation8 + $0x10] sm:$0xff] %v2388_v40  ;;  %v2398_v48 = vsub.f32 %v3948_v38, %v4032_v31  ;;  %v2399_v15 = vsub.f32 %v3952_v52, %v4032_v31  ;;  %v2400_v51 = vsub.f32 %v3956_v57, %v4032_v31 }
 0x505   :  { %2427 = vst [vmem:[#allocation8 + $0x18] sm:$0xff] %v2389_v42  ;;  %v2401_v29 = vsub.f32 %v2200_v39, %v4032_v31  ;;  %2428 = vst [vmem:[#allocation8 + $0x20] sm:$0xff] %v2390_v45  ;;  %v2402_v4 = vsub.f32 %v3960_v32, %v4032_v31  ;;  %v2403_v8 = vsub.f32 %v3964_v50, %v4032_v31 }
 0x506   :  { %2429 = vst [vmem:[#allocation8 + $0x28] sm:$0xff] %v2391_v37  ;;  %2430 = vst [vmem:[#allocation8 + $0x30] sm:$0xff] %v2392_v17  ;;  %v2404_v61 = vsub.f32 %v3968_v63, %v4032_v31  ;;  %v2405_v38 = vsub.f32 %v3972_v3, %v4032_v31  ;;  %v2406_v52 = vsub.f32 %v4014_v27, %v4032_v31 }
 0x507   :  { %2431 = vst [vmem:[#allocation8 + $0x38] sm:$0xff] %v2393_v7  ;;  %2432 = vst [vmem:[#allocation8 + $0x40] sm:$0xff] %v2394_v36  ;;  %v2407_v57 = vsub.f32 %v3976_v44, %v4032_v31  ;;  %v2408_v32 = vsub.f32 %v4018_v49, %v4032_v31  ;;  %v2409_v50 = vsub.f32 %v3980_v5, %v4032_v31 }
 0x508   :  { %2433 = vst [vmem:[#allocation8 + $0x48] sm:$0xff] %v2395_v13  ;;  %2434 = vst [vmem:[#allocation8 + $0x50] sm:$0xff] %v2396_v47  ;;  %v2410_v63 = vsub.f32 %v4022_v12, %v4032_v31  ;;  %v2411_v3 = vsub.f32 %v3984_v34, %v4032_v31  ;;  %v2412_v44 = vsub.f32 %v4026_v41, %v4032_v31 }
 0x509   :  { %2435 = vst [vmem:[#allocation8 + $0x58] sm:$0xff] %v2397_v62  ;;  %2436 = vst [vmem:[#allocation8 + $0x60] sm:$0xff] %v2398_v48  ;;  %v2413_v39 = vsub.f32 %v3988_v58, %v4032_v31  ;;  %v2414_v5 = vsub.f32 %v4030_v16, %v4032_v31  ;;  %v2415_v27 = vsub.f32 %v3992_v14, %v4032_v31 }
 0x50a   :  { %2437 = vst [vmem:[#allocation8 + $0x68] sm:$0xff] %v2399_v15  ;;  %2438 = vst [vmem:[#allocation8 + $0x70] sm:$0xff] %v2400_v51  ;;  %v2416_v23 = vsub.f32 %v4036_v24, %v4032_v31  ;;  %v2417_v34 = vsub.f32 %v3996_v9, %v4032_v31  ;;  %v2418_v58 = vsub.f32 %v4040_v1, %v4032_v31 }
 0x50b   :  { %2439 = vst [vmem:[#allocation8 + $0x78] sm:$0xff] %v2401_v29  ;;  %2440 = vst [vmem:[#allocation8 + $0x80] sm:$0xff] %v2402_v4  ;;  %v2419_v49 = vsub.f32 %v4000_v43, %v4032_v31  ;;  %v2420_v0 = vsub.f32 %v4044_v19, %v4032_v31  ;;  %v2421_v14 = vsub.f32 %v4004_v59, %v4032_v31 }
 0x50c   :  { %2441 = vst [vmem:[#allocation8 + $0x88] sm:$0xff] %v2403_v8  ;;  %2442 = vst [vmem:[#allocation8 + $0x90] sm:$0xff] %v2404_v61  ;;  %v2422_v9 = vsub.f32 %v4048_v25, %v4032_v31  ;;  %v2423_v43 = vsub.f32 %v4008_v54, %v4032_v31 }
 0x50d   :  { %2443 = vst [vmem:[#allocation8 + $0x98] sm:$0xff] %v2405_v38  ;;  %2444 = vst [vmem:[#allocation8 + $0xa0] sm:$0xff] %v2406_v52 }
 0x50e   :  { %2445 = vst [vmem:[#allocation8 + $0xa8] sm:$0xff] %v2407_v57  ;;  %2446 = vst [vmem:[#allocation8 + $0xb0] sm:$0xff] %v2408_v32 }
 0x50f   :  { %2447 = vst [vmem:[#allocation8 + $0xb8] sm:$0xff] %v2409_v50  ;;  %2448 = vst [vmem:[#allocation8 + $0xc0] sm:$0xff] %v2410_v63 }
 0x510   :  { %2449 = vst [vmem:[#allocation8 + $0xc8] sm:$0xff] %v2411_v3  ;;  %2450 = vst [vmem:[#allocation8 + $0xd0] sm:$0xff] %v2412_v44 }
 0x511   :  { %2451 = vst [vmem:[#allocation8 + $0xd8] sm:$0xff] %v2413_v39  ;;  %2452 = vst [vmem:[#allocation8 + $0xe0] sm:$0xff] %v2414_v5 }
 0x512   :  { %2453 = vst [vmem:[#allocation8 + $0xe8] sm:$0xff] %v2415_v27  ;;  %2454 = vst [vmem:[#allocation8 + $0xf0] sm:$0xff] %v2416_v23 }
 0x513   :  { %2455 = vst [vmem:[#allocation8 + $0xf8] sm:$0xff] %v2417_v34  ;;  %2456 = vst [vmem:[#allocation8 + $0x100] sm:$0xff] %v2418_v58 }
 0x514   :  { %2457 = vst [vmem:[#allocation8 + $0x108] sm:$0xff] %v2419_v49  ;;  %2458 = vst [vmem:[#allocation8 + $0x110] sm:$0xff] %v2420_v0 }
 0x515   :  { %2459 = vst [vmem:[#allocation8 + $0x118] sm:$0xff] %v2421_v14  ;;  %2460 = vst [vmem:[#allocation8 + $0x120] sm:$0xff] %v2422_v9 }
 0x516   :  { %2461 = vst [vmem:[#allocation8 + $0x128] sm:$0xff] %v2423_v43 }
 0x517   :  { %2949 = shalt.err (!%p2946_p6)
}
 0x518   :  { %s2950_s2 = scalar_lea.hbm %s4148_s11, 4864 }
 0x519   :  { %p2951_p7 = scmp.ne.s32.totalorder %s4148_s11, %s2950_s2  ;;  %p2954_p8 = scmp.lt.u32.totalorder %s2950_s2, %s4148_s11 }
 0x51b   :  { %p2956_p9 = pnand %p2954_p8, %p2951_p7 }
 0x51d   :  { %2959 = shalt.err (!%p2956_p9)
}
 0x51e   :  { %s2974_s29 = smov 128   ;;  %s2975_s30 = smov 8  }
 0x51f   :  { %2473 = dma.vmem_to_hbm [thread:$0]  %s4114_s3, 4864, %s4148_s11, [#allocation5], %s2974_s29, %s2974_s29, %s2975_s30  }
 0x520   :  { %2964 = dma.done.wait [#allocation5], 4864  }
 0x521   :  { %2965 = vsyncadd [#allocation5], 4294962432 }
 0x522   :  { %2477 = vsyncpa [#allocation4], 1 }
 0x523   :  { %2478 = vsyncpa [#allocation7], 1 }
 0x524   :  { %2479 = vsyncpa [#allocation5], 1 }

</bundles_post_ra>
